<compile_context>
chip_gen: v6e
topology: v6e:2x2x1
jax: 0.10.0
libtpu: 0.0.40
codegen_flags: <defaults>
</compile_context>

<pallas_src>
import jax
import jax.numpy as jnp
import numpy as np
from jax.experimental import pallas as pl
from jax.experimental.pallas import tpu as pltpu

ROW_STRIP = 32      # packed rows processed per inner strip (keeps slabs in vregs)
TB_TARGET = 2048    # packed rows per grid step (~1 MiB f32 / 0.5 MiB bf16 input tile)


def _cdiv(a, b):
    return (a + b - 1) // b


def _round_up(a, b):
    return _cdiv(a, b) * b


def cnn_kernel(x_ref, wc_ref, bc_ref, wsel_ref, bf_ref, o_ref):
    # x_ref    : VMEM (TB, LP)     lane-packed inputs: P sequences of length L per row
    # wc_ref   : SMEM (3*C,)       Conv1d weight, flattened (f32)
    # bc_ref   : SMEM (C,)         Conv1d bias (f32)
    # wsel_ref : VMEM (C, LP, P)   per-channel segment/fc-weight selector (compute dtype)
    # bf_ref   : SMEM (1,)         fc bias (f32)
    # o_ref    : VMEM (TB, P)      per-sequence logits (f32)
    TB, LP = x_ref.shape
    C, _, P = wsel_ref.shape
    L = LP // P
    cdt = x_ref.dtype
    RS = min(ROW_STRIP, TB)
    n_strips = TB // RS

    # Hoisted (loop-invariant): per-segment boundary masks + splatted conv weights.
    pos = jax.lax.broadcasted_iota(jnp.int32, (RS, LP), 1) % L
    left_edge = pos == 0
    right_edge = pos == (L - 1)
    wk = []
    for c in range(C):
        taps = tuple(jnp.full((1, 1), wc_ref[3 * c + k], jnp.float32).astype(cdt)
                     for k in range(3))
        bias_c = jnp.full((1, 1), bc_ref[c], jnp.float32).astype(cdt)
        wk.append(taps + (bias_c,))
    fc_bias = bf_ref[0]

    @pl.loop(0, n_strips)
    def _(s):
        r = pl.multiple_of(s * RS, RS)
        x = x_ref[pl.ds(r, RS), :]
        # Neighbor taps within each packed L-lane segment (zero pad at segment edges).
        x_left = jnp.where(left_edge, 0.0, pltpu.roll(x, shift=1, axis=1))
        x_right = jnp.where(right_edge, 0.0, pltpu.roll(x, shift=LP - 1, axis=1))

        out = jnp.zeros((RS, P), jnp.float32)
        for c in range(C):  # small static channel count -> unrolled
            w0, w1, w2, bcv = wk[c]
            conv = w0 * x_left + w1 * x + w2 * x_right + bcv       # Conv1d(1,C,3,pad=1)
            conv = jnp.maximum(conv, 0.0)                          # ReLU
            # MaxPool1d(2,2): valid results land on even lanes of each segment; the
            # wrapped odd boundary lane carries zero weight in wsel, so no masking needed.
            pooled = jnp.maximum(conv, pltpu.roll(conv, shift=LP - 1, axis=1))
            # Flatten + Linear(C*L//2 -> 1) as a segmented reduce on the MXU:
            # wsel[c, l, p] = fc weight on even lanes of segment p, zero elsewhere.
            out = out + jnp.dot(pooled, wsel_ref[c],
                                preferred_element_type=jnp.float32)
        o_ref[pl.ds(r, RS), :] = out + fc_bias


def pick_compute_dtype():
    """bf16 compute on v6e/v7x (bf16 VALU + halved HBM bytes); f32 elsewhere (v5e)."""
    try:
        kind = jax.devices()[0].device_kind.lower()
    except Exception:
        return jnp.float32
    if any(tag in kind for tag in ("v6", "v7", "tpu7")):
        return jnp.bfloat16
    return jnp.float32


def prepare_params(wc, bc, wf, bf, L, compute_dtype=jnp.float32):
    """One-time parameter prep (outside the per-call forward).

    wc: (C, 3) Conv1d weight (in_channels==1, squeezed); bc: (C, 1) bias;
    wf: (1, C*L//2) fc weight; bf: (1, 1) fc bias.
    Builds the per-channel (LP, P) segment/fc-weight selector used by the in-kernel MXU dot.
    """
    C = wc.shape[0]
    assert L % 2 == 0, "even-lane MaxPool trick requires even L"
    Lh = L // 2
    assert wf.shape[-1] == C * Lh
    P = max(1, 128 // L)          # sequences packed per vreg row
    LP = P * L

    lanes = jnp.arange(LP)
    pos = lanes % L               # position within a packed segment
    seg = lanes // L              # which packed sequence
    widx = pos // 2               # pooled index within the segment
    # fc weight on even lanes (flatten order c*Lh + m), zero on odd lanes.
    w_lane = jnp.where((pos % 2) == 0, wf.reshape(C, Lh)[:, widx], 0.0)        # (C, LP)
    sel = (seg[:, None] == jnp.arange(P)[None, :]).astype(jnp.float32)         # (LP, P)
    wsel = (w_lane[:, :, None] * sel[None, :, :]).astype(compute_dtype)        # (C, LP, P)

    return dict(
        wc=jnp.asarray(wc, jnp.float32).reshape(-1),   # (3*C,)  1-D SMEM (no 2-D padding)
        bc=jnp.asarray(bc, jnp.float32).reshape(-1),   # (C,)
        bf=jnp.asarray(bf, jnp.float32).reshape(-1),   # (1,)
        wsel=wsel, L=int(L), P=int(P), LP=int(LP), C=int(C),
    )


def _tile_rows(rows):
    """Pick (TB, rows_pad): big tiles (>= ~0.5 MiB/step), >=2 grid steps when possible."""
    if rows <= ROW_STRIP:
        return ROW_STRIP, ROW_STRIP
    n = max(2, _cdiv(rows, TB_TARGET))            # >=2 so v7x megacore can split the grid
    tb = _round_up(_cdiv(rows, n), ROW_STRIP)     # multiple of the strip size
    return tb, n * tb


def cnn_forward(x, params):
    """x: (B, L); returns (B, 1) logits matching CNN.forward."""
    B, L = x.shape
    assert L == params["L"]
    P, LP, C = params["P"], params["LP"], params["C"]
    cdt = params["wsel"].dtype

    rows = _cdiv(B, P)                    # packed rows needed
    TB, rows_pad = _tile_rows(rows)
    grid = (rows_pad // TB,)
    Bp = rows_pad * P

    # Pad the batch (zeros) so the fast path is unconditional, then lane-pack P seqs/row.
    x_pad = jnp.zeros((Bp, L), cdt).at[:B, :].set(x.astype(cdt))
    x_packed = x_pad.reshape(rows_pad, LP)

    # VMEM budget: double-buffered input + lane-padded output + selector weights + slack.
    itemsize = jnp.dtype(cdt).itemsize
    x_tile = TB * LP * itemsize
    out_tile = TB * 128 * 4               # (TB, P) output padded to 128 lanes in VMEM
    wsel_bytes = C * LP * 128 * itemsize
    vmem_limit = int(min(48 * 2**20,
                         max(16 * 2**20, 2 * (x_tile + out_tile + wsel_bytes) + 4 * 2**20)))

    out_packed = pl.pallas_call(
        cnn_kernel,
        out_shape=jax.ShapeDtypeStruct((rows_pad, P), jnp.float32),
        grid=grid,
        in_specs=[
            pl.BlockSpec((TB, LP), lambda b: (b, 0)),               # packed inputs (VMEM)
            pl.BlockSpec(memory_space=pltpu.MemorySpace.SMEM),      # conv weight (1-D)
            pl.BlockSpec(memory_space=pltpu.MemorySpace.SMEM),      # conv bias (1-D)
            pl.BlockSpec((C, LP, P), lambda b: (0, 0, 0)),          # fc/segment selector (VMEM)
            pl.BlockSpec(memory_space=pltpu.MemorySpace.SMEM),      # fc bias (1-D)
        ],
        out_specs=pl.BlockSpec((TB, P), lambda b: (b, 0)),
        compiler_params=pltpu.CompilerParams(
            dimension_semantics=("parallel",),      # batch rows -> both TCs on v7x
            vmem_limit_bytes=vmem_limit,
        ),
    )(x_packed, params["wc"], params["bc"], params["wsel"], params["bf"])

    return out_packed.reshape(Bp, 1)[:B]


def ref_forward(x, wc, bc, wf, bf):
    """Pure-JAX f32 reference matching the PyTorch forward."""
    B, L = x.shape
    C = wc.shape[0]
    xp = jnp.pad(x, ((0, 0), (1, 1)))
    windows = jnp.stack([xp[:, k:k + L] for k in range(3)], axis=-1)      # (B, L, 3)
    conv = jnp.einsum('blk,ck->bcl', windows, wc) + bc.reshape(1, C, 1)   # (B, C, L)
    conv = jnp.maximum(conv, 0.0)
    pooled = conv.reshape(B, C, L // 2, 2).max(axis=-1)                   # (B, C, L//2)
    flat = pooled.reshape(B, -1)                                          # (B, C*L//2)
    return flat @ wf.T + bf.reshape(1, 1)                                 # (B, 1)


if __name__ == "__main__":
    B, L = 2, 16          # x.unsqueeze(1) -> Conv1d in_channels=1 over length-16 sequences
    C = 4                 # num_channels
    Lh = L // 2           # MaxPool1d(2,2) output length; flattened_size = C * Lh
    # num_classes is unused by the reference forward (lazily-created fc outputs 1 feature)

    key = jax.random.PRNGKey(0)
    k1, k2, k3, k4, k5 = jax.random.split(key, 5)
    x = jax.random.normal(k1, (B, L), jnp.float32)
    wc = jax.random.normal(k2, (C, 3), jnp.float32) * 0.3        # Conv1d weight (C,1,3) squeezed
    bc = jax.random.normal(k3, (C, 1), jnp.float32) * 0.1        # Conv1d bias
    wf = jax.random.normal(k4, (1, C * Lh), jnp.float32) * 0.2   # nn.Linear(C*Lh, 1) weight
    bf = jax.random.normal(k5, (1, 1), jnp.float32) * 0.1        # fc bias

    cdt = pick_compute_dtype()

    def run(dtype):
        params = prepare_params(wc, bc, wf, bf, L=L, compute_dtype=dtype)
        return jax.block_until_ready(cnn_forward(x, params))

    try:
        out = run(cdt)
    except Exception:
        # bf16 compute is a v6e/v7x perf option only; fall back to the f32 path.
        cdt = jnp.float32
        out = run(cdt)

    ref = jax.block_until_ready(ref_forward(x, wc, bc, wf, bf))

    if jnp.dtype(cdt) == jnp.dtype(jnp.bfloat16):
        rtol, atol = 5e-2, 5e-2
    else:
        rtol, atol = 1e-5, 1e-5

    assert out.shape == (B, 1), out.shape
    np.testing.assert_allclose(np.asarray(out), np.asarray(ref), rtol=rtol, atol=atol)
    print("KERNEL_OK")
</pallas_src>

<mosaic_0001>
module attributes {stable_mosaic.version = 11 : i64} {
  func.func @cnn_kernel(%arg0: i32, %arg1: memref<32x128xf32, #tpu.memory_space<vmem>>, %arg2: memref<12xf32, #tpu.memory_space<smem>>, %arg3: memref<4xf32, #tpu.memory_space<smem>>, %arg4: memref<4x128x8xf32, #tpu.memory_space<vmem>>, %arg5: memref<1xf32, #tpu.memory_space<smem>>, %arg6: memref<32x8xf32, #tpu.memory_space<vmem>>) attributes {dimension_semantics = [#tpu.dimension_semantics<parallel>], iteration_bounds = array<i64: 1>, scalar_prefetch = 0 : i64, scratch_operands = 0 : i64, tpu.core_type = #tpu.core_type<tc>, window_params = [{transform_indices = @transform_0, window_bounds = array<i64: 32, 128>}, {transform_indices = @transform_1, window_bounds = array<i64: 12>}, {transform_indices = @transform_2, window_bounds = array<i64: 4>}, {pipeline_mode = #tpu.pipeline_mode<synchronous>, transform_indices = @transform_3, window_bounds = array<i64: 4, 128, 8>}, {transform_indices = @transform_4, window_bounds = array<i64: 1>}, {transform_indices = @transform_5, window_bounds = array<i64: 32, 8>}]} {
    %0 = tpu.iota {dimensions = array<i32: 1>} : vector<32x128xi32>
    %c16_i32 = arith.constant 16 : i32
    %c0_i32 = arith.constant 0 : i32
    %1 = arith.cmpi eq, %c16_i32, %c0_i32 : i32
    %c1_i32 = arith.constant 1 : i32
    %2 = arith.select %1, %c1_i32, %c16_i32 : i32
    %3 = vector.broadcast %2 : i32 to vector<32x128xi32>
    %4 = arith.remsi %0, %3 : vector<32x128xi32>
    %c0_i32_0 = arith.constant 0 : i32
    %5 = vector.broadcast %c0_i32_0 : i32 to vector<32x128xi32>
    %6 = arith.cmpi ne, %4, %5 : vector<32x128xi32>
    %c0_i32_1 = arith.constant 0 : i32
    %7 = vector.broadcast %c0_i32_1 : i32 to vector<32x128xi32>
    %8 = arith.cmpi slt, %4, %7 : vector<32x128xi32>
    %c0_i32_2 = arith.constant 0 : i32
    %9 = arith.cmpi slt, %2, %c0_i32_2 : i32
    %10 = vector.broadcast %9 : i1 to vector<32x128xi1>
    %11 = vector.broadcast %10 : vector<32x128xi1> to vector<32x128xi1>
    %12 = arith.xori %8, %11 : vector<32x128xi1>
    %13 = arith.andi %12, %6 : vector<32x128xi1>
    %14 = vector.broadcast %2 : i32 to vector<32x128xi32>
    %15 = arith.addi %4, %14 : vector<32x128xi32>
    %16 = arith.select %13, %15, %4 : vector<32x128xi1>, vector<32x128xi32>
    %c0_i32_3 = arith.constant 0 : i32
    %17 = vector.broadcast %c0_i32_3 : i32 to vector<32x128xi32>
    %18 = arith.cmpi eq, %16, %17 : vector<32x128xi32>
    %c15_i32 = arith.constant 15 : i32
    %19 = vector.broadcast %c15_i32 : i32 to vector<32x128xi32>
    %20 = arith.cmpi eq, %16, %19 : vector<32x128xi32>
    %c0 = arith.constant 0 : index
    %21 = memref.load %arg2[%c0] : memref<12xf32, #tpu.memory_space<smem>>
    %22 = vector.broadcast %21 : f32 to vector<1x1xf32>
    %c1 = arith.constant 1 : index
    %23 = memref.load %arg2[%c1] : memref<12xf32, #tpu.memory_space<smem>>
    %24 = vector.broadcast %23 : f32 to vector<1x1xf32>
    %c2 = arith.constant 2 : index
    %25 = memref.load %arg2[%c2] : memref<12xf32, #tpu.memory_space<smem>>
    %26 = vector.broadcast %25 : f32 to vector<1x1xf32>
    %c0_4 = arith.constant 0 : index
    %27 = memref.load %arg3[%c0_4] : memref<4xf32, #tpu.memory_space<smem>>
    %28 = vector.broadcast %27 : f32 to vector<1x1xf32>
    %c3 = arith.constant 3 : index
    %29 = memref.load %arg2[%c3] : memref<12xf32, #tpu.memory_space<smem>>
    %30 = vector.broadcast %29 : f32 to vector<1x1xf32>
    %c4 = arith.constant 4 : index
    %31 = memref.load %arg2[%c4] : memref<12xf32, #tpu.memory_space<smem>>
    %32 = vector.broadcast %31 : f32 to vector<1x1xf32>
    %c5 = arith.constant 5 : index
    %33 = memref.load %arg2[%c5] : memref<12xf32, #tpu.memory_space<smem>>
    %34 = vector.broadcast %33 : f32 to vector<1x1xf32>
    %c1_5 = arith.constant 1 : index
    %35 = memref.load %arg3[%c1_5] : memref<4xf32, #tpu.memory_space<smem>>
    %36 = vector.broadcast %35 : f32 to vector<1x1xf32>
    %c6 = arith.constant 6 : index
    %37 = memref.load %arg2[%c6] : memref<12xf32, #tpu.memory_space<smem>>
    %38 = vector.broadcast %37 : f32 to vector<1x1xf32>
    %c7 = arith.constant 7 : index
    %39 = memref.load %arg2[%c7] : memref<12xf32, #tpu.memory_space<smem>>
    %40 = vector.broadcast %39 : f32 to vector<1x1xf32>
    %c8 = arith.constant 8 : index
    %41 = memref.load %arg2[%c8] : memref<12xf32, #tpu.memory_space<smem>>
    %42 = vector.broadcast %41 : f32 to vector<1x1xf32>
    %c2_6 = arith.constant 2 : index
    %43 = memref.load %arg3[%c2_6] : memref<4xf32, #tpu.memory_space<smem>>
    %44 = vector.broadcast %43 : f32 to vector<1x1xf32>
    %c9 = arith.constant 9 : index
    %45 = memref.load %arg2[%c9] : memref<12xf32, #tpu.memory_space<smem>>
    %46 = vector.broadcast %45 : f32 to vector<1x1xf32>
    %c10 = arith.constant 10 : index
    %47 = memref.load %arg2[%c10] : memref<12xf32, #tpu.memory_space<smem>>
    %48 = vector.broadcast %47 : f32 to vector<1x1xf32>
    %c11 = arith.constant 11 : index
    %49 = memref.load %arg2[%c11] : memref<12xf32, #tpu.memory_space<smem>>
    %50 = vector.broadcast %49 : f32 to vector<1x1xf32>
    %c3_7 = arith.constant 3 : index
    %51 = memref.load %arg3[%c3_7] : memref<4xf32, #tpu.memory_space<smem>>
    %52 = vector.broadcast %51 : f32 to vector<1x1xf32>
    %c0_8 = arith.constant 0 : index
    %53 = memref.load %arg5[%c0_8] : memref<1xf32, #tpu.memory_space<smem>>
    %c0_i32_9 = arith.constant 0 : i32
    %c1_i32_10 = arith.constant 1 : i32
    %54 = arith.muli %c0_i32_9, %c1_i32_10 : i32
    %c0_i32_11 = arith.constant 0 : i32
    %55 = arith.addi %c0_i32_11, %54 : i32
    %c32_i32 = arith.constant 32 : i32
    %56 = arith.muli %55, %c32_i32 : i32
    %57 = tpu.assume_multiple %56, 32 : i32
    %58 = arith.index_cast %57 : i32 to index
    %c0_12 = arith.constant 0 : index
    %59 = vector.load %arg1[%58, %c0_12] : memref<32x128xf32, #tpu.memory_space<vmem>>, vector<32x128xf32>
    %c1_i32_13 = arith.constant 1 : i32
    %60 = tpu.dynamic_rotate %59 by %c1_i32_13 dim 1 : vector<32x128xf32>, i32 -> vector<32x128xf32>
    %cst = arith.constant 0.000000e+00 : f32
    %61 = vector.broadcast %cst : f32 to vector<32x128xf32>
    %62 = arith.select %18, %61, %60 : vector<32x128xi1>, vector<32x128xf32>
    %c127_i32 = arith.constant 127 : i32
    %63 = tpu.dynamic_rotate %59 by %c127_i32 dim 1 : vector<32x128xf32>, i32 -> vector<32x128xf32>
    %cst_14 = arith.constant 0.000000e+00 : f32
    %64 = vector.broadcast %cst_14 : f32 to vector<32x128xf32>
    %65 = arith.select %20, %64, %63 : vector<32x128xi1>, vector<32x128xf32>
    %cst_15 = arith.constant 0.000000e+00 : f32
    %66 = vector.broadcast %cst_15 : f32 to vector<32x8xf32>
    %67 = vector.broadcast %22 : vector<1x1xf32> to vector<32x128xf32>
    %68 = arith.mulf %67, %62 : vector<32x128xf32>
    %69 = vector.broadcast %24 : vector<1x1xf32> to vector<32x128xf32>
    %70 = arith.mulf %69, %59 : vector<32x128xf32>
    %71 = arith.addf %68, %70 : vector<32x128xf32>
    %72 = vector.broadcast %26 : vector<1x1xf32> to vector<32x128xf32>
    %73 = arith.mulf %72, %65 : vector<32x128xf32>
    %74 = arith.addf %71, %73 : vector<32x128xf32>
    %75 = vector.broadcast %28 : vector<1x1xf32> to vector<32x128xf32>
    %76 = arith.addf %74, %75 : vector<32x128xf32>
    %cst_16 = arith.constant 0.000000e+00 : f32
    %77 = vector.broadcast %cst_16 : f32 to vector<32x128xf32>
    %78 = arith.maximumf %76, %77 : vector<32x128xf32>
    %c127_i32_17 = arith.constant 127 : i32
    %79 = tpu.dynamic_rotate %78 by %c127_i32_17 dim 1 : vector<32x128xf32>, i32 -> vector<32x128xf32>
    %80 = arith.maximumf %78, %79 : vector<32x128xf32>
    %c0_18 = arith.constant 0 : index
    %c0_19 = arith.constant 0 : index
    %c0_20 = arith.constant 0 : index
    %81 = vector.load %arg4[%c0_18, %c0_19, %c0_20] : memref<4x128x8xf32, #tpu.memory_space<vmem>>, vector<1x128x8xf32>
    %82 = vector.shape_cast %81 : vector<1x128x8xf32> to vector<128x8xf32>
    %cst_21 = arith.constant dense<0.000000e+00> : vector<32x8xf32>
    %83 = tpu.matmul %80, %82, %cst_21 {dimension_numbers = #tpu.dot_dimension_numbers<[1], [0], [0], [1], [0, 0, 1, 1], [], []>} : vector<32x128xf32>, vector<128x8xf32>, vector<32x8xf32> -> vector<32x8xf32>
    %84 = arith.addf %66, %83 : vector<32x8xf32>
    %85 = vector.broadcast %30 : vector<1x1xf32> to vector<32x128xf32>
    %86 = arith.mulf %85, %62 : vector<32x128xf32>
    %87 = vector.broadcast %32 : vector<1x1xf32> to vector<32x128xf32>
    %88 = arith.mulf %87, %59 : vector<32x128xf32>
    %89 = arith.addf %86, %88 : vector<32x128xf32>
    %90 = vector.broadcast %34 : vector<1x1xf32> to vector<32x128xf32>
    %91 = arith.mulf %90, %65 : vector<32x128xf32>
    %92 = arith.addf %89, %91 : vector<32x128xf32>
    %93 = vector.broadcast %36 : vector<1x1xf32> to vector<32x128xf32>
    %94 = arith.addf %92, %93 : vector<32x128xf32>
    %cst_22 = arith.constant 0.000000e+00 : f32
    %95 = vector.broadcast %cst_22 : f32 to vector<32x128xf32>
    %96 = arith.maximumf %94, %95 : vector<32x128xf32>
    %c127_i32_23 = arith.constant 127 : i32
    %97 = tpu.dynamic_rotate %96 by %c127_i32_23 dim 1 : vector<32x128xf32>, i32 -> vector<32x128xf32>
    %98 = arith.maximumf %96, %97 : vector<32x128xf32>
    %c1_24 = arith.constant 1 : index
    %c0_25 = arith.constant 0 : index
    %c0_26 = arith.constant 0 : index
    %99 = vector.load %arg4[%c1_24, %c0_25, %c0_26] : memref<4x128x8xf32, #tpu.memory_space<vmem>>, vector<1x128x8xf32>
    %100 = vector.shape_cast %99 : vector<1x128x8xf32> to vector<128x8xf32>
    %cst_27 = arith.constant dense<0.000000e+00> : vector<32x8xf32>
    %101 = tpu.matmul %98, %100, %cst_27 {dimension_numbers = #tpu.dot_dimension_numbers<[1], [0], [0], [1], [0, 0, 1, 1], [], []>} : vector<32x128xf32>, vector<128x8xf32>, vector<32x8xf32> -> vector<32x8xf32>
    %102 = arith.addf %84, %101 : vector<32x8xf32>
    %103 = vector.broadcast %38 : vector<1x1xf32> to vector<32x128xf32>
    %104 = arith.mulf %103, %62 : vector<32x128xf32>
    %105 = vector.broadcast %40 : vector<1x1xf32> to vector<32x128xf32>
    %106 = arith.mulf %105, %59 : vector<32x128xf32>
    %107 = arith.addf %104, %106 : vector<32x128xf32>
    %108 = vector.broadcast %42 : vector<1x1xf32> to vector<32x128xf32>
    %109 = arith.mulf %108, %65 : vector<32x128xf32>
    %110 = arith.addf %107, %109 : vector<32x128xf32>
    %111 = vector.broadcast %44 : vector<1x1xf32> to vector<32x128xf32>
    %112 = arith.addf %110, %111 : vector<32x128xf32>
    %cst_28 = arith.constant 0.000000e+00 : f32
    %113 = vector.broadcast %cst_28 : f32 to vector<32x128xf32>
    %114 = arith.maximumf %112, %113 : vector<32x128xf32>
    %c127_i32_29 = arith.constant 127 : i32
    %115 = tpu.dynamic_rotate %114 by %c127_i32_29 dim 1 : vector<32x128xf32>, i32 -> vector<32x128xf32>
    %116 = arith.maximumf %114, %115 : vector<32x128xf32>
    %c2_30 = arith.constant 2 : index
    %c0_31 = arith.constant 0 : index
    %c0_32 = arith.constant 0 : index
    %117 = vector.load %arg4[%c2_30, %c0_31, %c0_32] : memref<4x128x8xf32, #tpu.memory_space<vmem>>, vector<1x128x8xf32>
    %118 = vector.shape_cast %117 : vector<1x128x8xf32> to vector<128x8xf32>
    %cst_33 = arith.constant dense<0.000000e+00> : vector<32x8xf32>
    %119 = tpu.matmul %116, %118, %cst_33 {dimension_numbers = #tpu.dot_dimension_numbers<[1], [0], [0], [1], [0, 0, 1, 1], [], []>} : vector<32x128xf32>, vector<128x8xf32>, vector<32x8xf32> -> vector<32x8xf32>
    %120 = arith.addf %102, %119 : vector<32x8xf32>
    %121 = vector.broadcast %46 : vector<1x1xf32> to vector<32x128xf32>
    %122 = arith.mulf %121, %62 : vector<32x128xf32>
    %123 = vector.broadcast %48 : vector<1x1xf32> to vector<32x128xf32>
    %124 = arith.mulf %123, %59 : vector<32x128xf32>
    %125 = arith.addf %122, %124 : vector<32x128xf32>
    %126 = vector.broadcast %50 : vector<1x1xf32> to vector<32x128xf32>
    %127 = arith.mulf %126, %65 : vector<32x128xf32>
    %128 = arith.addf %125, %127 : vector<32x128xf32>
    %129 = vector.broadcast %52 : vector<1x1xf32> to vector<32x128xf32>
    %130 = arith.addf %128, %129 : vector<32x128xf32>
    %cst_34 = arith.constant 0.000000e+00 : f32
    %131 = vector.broadcast %cst_34 : f32 to vector<32x128xf32>
    %132 = arith.maximumf %130, %131 : vector<32x128xf32>
    %c127_i32_35 = arith.constant 127 : i32
    %133 = tpu.dynamic_rotate %132 by %c127_i32_35 dim 1 : vector<32x128xf32>, i32 -> vector<32x128xf32>
    %134 = arith.maximumf %132, %133 : vector<32x128xf32>
    %c3_36 = arith.constant 3 : index
    %c0_37 = arith.constant 0 : index
    %c0_38 = arith.constant 0 : index
    %135 = vector.load %arg4[%c3_36, %c0_37, %c0_38] : memref<4x128x8xf32, #tpu.memory_space<vmem>>, vector<1x128x8xf32>
    %136 = vector.shape_cast %135 : vector<1x128x8xf32> to vector<128x8xf32>
    %cst_39 = arith.constant dense<0.000000e+00> : vector<32x8xf32>
    %137 = tpu.matmul %134, %136, %cst_39 {dimension_numbers = #tpu.dot_dimension_numbers<[1], [0], [0], [1], [0, 0, 1, 1], [], []>} : vector<32x128xf32>, vector<128x8xf32>, vector<32x8xf32> -> vector<32x8xf32>
    %138 = arith.addf %120, %137 : vector<32x8xf32>
    %139 = vector.broadcast %53 : f32 to vector<32x8xf32>
    %140 = arith.addf %138, %139 : vector<32x8xf32>
    %141 = arith.index_cast %57 : i32 to index
    %c0_40 = arith.constant 0 : index
    %142 = vector.load %arg6[%141, %c0_40] : memref<32x8xf32, #tpu.memory_space<vmem>>, vector<32x8xf32>
    tpu.vector_store %arg6[%141, %c0_40], %140 {strides = array<i32>} : memref<32x8xf32, #tpu.memory_space<vmem>>, vector<32x8xf32>,
    %c1_i32_41 = arith.constant 1 : i32
    return
  }
  func.func @transform_0(%arg0: i32) -> (i32, i32) {
    %c0_i32 = arith.constant 0 : i32
    %c0_i32_0 = arith.constant 0 : i32
    return %arg0, %c0_i32 : i32, i32
  }
  func.func @transform_1(%arg0: i32) -> i32 {
    %c0_i32 = arith.constant 0 : i32
    %c0_i32_0 = arith.constant 0 : i32
    return %c0_i32 : i32
  }
  func.func @transform_2(%arg0: i32) -> i32 {
    %c0_i32 = arith.constant 0 : i32
    %c0_i32_0 = arith.constant 0 : i32
    return %c0_i32 : i32
  }
  func.func @transform_3(%arg0: i32) -> (i32, i32, i32) {
    %c0_i32 = arith.constant 0 : i32
    %c0_i32_0 = arith.constant 0 : i32
    %c0_i32_1 = arith.constant 0 : i32
    %c0_i32_2 = arith.constant 0 : i32
    return %c0_i32, %c0_i32_0, %c0_i32_1 : i32, i32, i32
  }
  func.func @transform_4(%arg0: i32) -> i32 {
    %c0_i32 = arith.constant 0 : i32
    %c0_i32_0 = arith.constant 0 : i32
    return %c0_i32 : i32
  }
  func.func @transform_5(%arg0: i32) -> (i32, i32) {
    %c0_i32 = arith.constant 0 : i32
    %c0_i32_0 = arith.constant 0 : i32
    return %arg0, %c0_i32 : i32, i32
  }
}

module attributes {stable_mosaic.version = 11 : i64} {
  func.func @cnn_kernel(%arg0: i32, %arg1: memref<32x128xf32, #tpu.memory_space<vmem>>, %arg2: memref<12xf32, #tpu.memory_space<smem>>, %arg3: memref<4xf32, #tpu.memory_space<smem>>, %arg4: memref<4x128x8xf32, #tpu.memory_space<vmem>>, %arg5: memref<1xf32, #tpu.memory_space<smem>>, %arg6: memref<32x8xf32, #tpu.memory_space<vmem>>) attributes {dimension_semantics = [#tpu.dimension_semantics<parallel>], iteration_bounds = array<i64: 1>, scalar_prefetch = 0 : i64, scratch_operands = 0 : i64, tpu.core_type = #tpu.core_type<tc>, window_params = [{transform_indices = @transform_0, window_bounds = array<i64: 32, 128>}, {transform_indices = @transform_1, window_bounds = array<i64: 12>}, {transform_indices = @transform_2, window_bounds = array<i64: 4>}, {pipeline_mode = #tpu.pipeline_mode<synchronous>, transform_indices = @transform_3, window_bounds = array<i64: 4, 128, 8>}, {transform_indices = @transform_4, window_bounds = array<i64: 1>}, {transform_indices = @transform_5, window_bounds = array<i64: 32, 8>}]} {
    %0 = tpu.iota {dimensions = array<i32: 1>} : vector<32x128xi32>
    %c16_i32 = arith.constant 16 : i32
    %c0_i32 = arith.constant 0 : i32
    %1 = arith.cmpi eq, %c16_i32, %c0_i32 : i32
    %c1_i32 = arith.constant 1 : i32
    %2 = arith.select %1, %c1_i32, %c16_i32 : i32
    %3 = vector.broadcast %2 : i32 to vector<32x128xi32>
    %4 = arith.remsi %0, %3 : vector<32x128xi32>
    %c0_i32_0 = arith.constant 0 : i32
    %5 = vector.broadcast %c0_i32_0 : i32 to vector<32x128xi32>
    %6 = arith.cmpi ne, %4, %5 : vector<32x128xi32>
    %c0_i32_1 = arith.constant 0 : i32
    %7 = vector.broadcast %c0_i32_1 : i32 to vector<32x128xi32>
    %8 = arith.cmpi slt, %4, %7 : vector<32x128xi32>
    %c0_i32_2 = arith.constant 0 : i32
    %9 = arith.cmpi slt, %2, %c0_i32_2 : i32
    %10 = vector.broadcast %9 : i1 to vector<32x128xi1>
    %11 = vector.broadcast %10 : vector<32x128xi1> to vector<32x128xi1>
    %12 = arith.xori %8, %11 : vector<32x128xi1>
    %13 = arith.andi %12, %6 : vector<32x128xi1>
    %14 = vector.broadcast %2 : i32 to vector<32x128xi32>
    %15 = arith.addi %4, %14 : vector<32x128xi32>
    %16 = arith.select %13, %15, %4 : vector<32x128xi1>, vector<32x128xi32>
    %c0_i32_3 = arith.constant 0 : i32
    %17 = vector.broadcast %c0_i32_3 : i32 to vector<32x128xi32>
    %18 = arith.cmpi eq, %16, %17 : vector<32x128xi32>
    %c15_i32 = arith.constant 15 : i32
    %19 = vector.broadcast %c15_i32 : i32 to vector<32x128xi32>
    %20 = arith.cmpi eq, %16, %19 : vector<32x128xi32>
    %c0 = arith.constant 0 : index
    %21 = memref.load %arg2[%c0] : memref<12xf32, #tpu.memory_space<smem>>
    %22 = vector.broadcast %21 : f32 to vector<1x1xf32>
    %c1 = arith.constant 1 : index
    %23 = memref.load %arg2[%c1] : memref<12xf32, #tpu.memory_space<smem>>
    %24 = vector.broadcast %23 : f32 to vector<1x1xf32>
    %c2 = arith.constant 2 : index
    %25 = memref.load %arg2[%c2] : memref<12xf32, #tpu.memory_space<smem>>
    %26 = vector.broadcast %25 : f32 to vector<1x1xf32>
    %c0_4 = arith.constant 0 : index
    %27 = memref.load %arg3[%c0_4] : memref<4xf32, #tpu.memory_space<smem>>
    %28 = vector.broadcast %27 : f32 to vector<1x1xf32>
    %c3 = arith.constant 3 : index
    %29 = memref.load %arg2[%c3] : memref<12xf32, #tpu.memory_space<smem>>
    %30 = vector.broadcast %29 : f32 to vector<1x1xf32>
    %c4 = arith.constant 4 : index
    %31 = memref.load %arg2[%c4] : memref<12xf32, #tpu.memory_space<smem>>
    %32 = vector.broadcast %31 : f32 to vector<1x1xf32>
    %c5 = arith.constant 5 : index
    %33 = memref.load %arg2[%c5] : memref<12xf32, #tpu.memory_space<smem>>
    %34 = vector.broadcast %33 : f32 to vector<1x1xf32>
    %c1_5 = arith.constant 1 : index
    %35 = memref.load %arg3[%c1_5] : memref<4xf32, #tpu.memory_space<smem>>
    %36 = vector.broadcast %35 : f32 to vector<1x1xf32>
    %c6 = arith.constant 6 : index
    %37 = memref.load %arg2[%c6] : memref<12xf32, #tpu.memory_space<smem>>
    %38 = vector.broadcast %37 : f32 to vector<1x1xf32>
    %c7 = arith.constant 7 : index
    %39 = memref.load %arg2[%c7] : memref<12xf32, #tpu.memory_space<smem>>
    %40 = vector.broadcast %39 : f32 to vector<1x1xf32>
    %c8 = arith.constant 8 : index
    %41 = memref.load %arg2[%c8] : memref<12xf32, #tpu.memory_space<smem>>
    %42 = vector.broadcast %41 : f32 to vector<1x1xf32>
    %c2_6 = arith.constant 2 : index
    %43 = memref.load %arg3[%c2_6] : memref<4xf32, #tpu.memory_space<smem>>
    %44 = vector.broadcast %43 : f32 to vector<1x1xf32>
    %c9 = arith.constant 9 : index
    %45 = memref.load %arg2[%c9] : memref<12xf32, #tpu.memory_space<smem>>
    %46 = vector.broadcast %45 : f32 to vector<1x1xf32>
    %c10 = arith.constant 10 : index
    %47 = memref.load %arg2[%c10] : memref<12xf32, #tpu.memory_space<smem>>
    %48 = vector.broadcast %47 : f32 to vector<1x1xf32>
    %c11 = arith.constant 11 : index
    %49 = memref.load %arg2[%c11] : memref<12xf32, #tpu.memory_space<smem>>
    %50 = vector.broadcast %49 : f32 to vector<1x1xf32>
    %c3_7 = arith.constant 3 : index
    %51 = memref.load %arg3[%c3_7] : memref<4xf32, #tpu.memory_space<smem>>
    %52 = vector.broadcast %51 : f32 to vector<1x1xf32>
    %c0_8 = arith.constant 0 : index
    %53 = memref.load %arg5[%c0_8] : memref<1xf32, #tpu.memory_space<smem>>
    %c0_i32_9 = arith.constant 0 : i32
    %c1_i32_10 = arith.constant 1 : i32
    %54 = arith.muli %c0_i32_9, %c1_i32_10 : i32
    %c0_i32_11 = arith.constant 0 : i32
    %55 = arith.addi %c0_i32_11, %54 : i32
    %c32_i32 = arith.constant 32 : i32
    %56 = arith.muli %55, %c32_i32 : i32
    %57 = tpu.assume_multiple %56, 32 : i32
    %58 = arith.index_cast %57 : i32 to index
    %c0_12 = arith.constant 0 : index
    %59 = vector.load %arg1[%58, %c0_12] : memref<32x128xf32, #tpu.memory_space<vmem>>, vector<32x128xf32>
    %c1_i32_13 = arith.constant 1 : i32
    %60 = tpu.dynamic_rotate %59 by %c1_i32_13 dim 1 : vector<32x128xf32>, i32 -> vector<32x128xf32>
    %cst = arith.constant 0.000000e+00 : f32
    %61 = vector.broadcast %cst : f32 to vector<32x128xf32>
    %62 = arith.select %18, %61, %60 : vector<32x128xi1>, vector<32x128xf32>
    %c127_i32 = arith.constant 127 : i32
    %63 = tpu.dynamic_rotate %59 by %c127_i32 dim 1 : vector<32x128xf32>, i32 -> vector<32x128xf32>
    %cst_14 = arith.constant 0.000000e+00 : f32
    %64 = vector.broadcast %cst_14 : f32 to vector<32x128xf32>
    %65 = arith.select %20, %64, %63 : vector<32x128xi1>, vector<32x128xf32>
    %cst_15 = arith.constant 0.000000e+00 : f32
    %66 = vector.broadcast %cst_15 : f32 to vector<32x8xf32>
    %67 = vector.broadcast %22 : vector<1x1xf32> to vector<32x128xf32>
    %68 = arith.mulf %67, %62 : vector<32x128xf32>
    %69 = vector.broadcast %24 : vector<1x1xf32> to vector<32x128xf32>
    %70 = arith.mulf %69, %59 : vector<32x128xf32>
    %71 = arith.addf %68, %70 : vector<32x128xf32>
    %72 = vector.broadcast %26 : vector<1x1xf32> to vector<32x128xf32>
    %73 = arith.mulf %72, %65 : vector<32x128xf32>
    %74 = arith.addf %71, %73 : vector<32x128xf32>
    %75 = vector.broadcast %28 : vector<1x1xf32> to vector<32x128xf32>
    %76 = arith.addf %74, %75 : vector<32x128xf32>
    %cst_16 = arith.constant 0.000000e+00 : f32
    %77 = vector.broadcast %cst_16 : f32 to vector<32x128xf32>
    %78 = arith.maximumf %76, %77 : vector<32x128xf32>
    %c127_i32_17 = arith.constant 127 : i32
    %79 = tpu.dynamic_rotate %78 by %c127_i32_17 dim 1 : vector<32x128xf32>, i32 -> vector<32x128xf32>
    %80 = arith.maximumf %78, %79 : vector<32x128xf32>
    %c0_18 = arith.constant 0 : index
    %c0_19 = arith.constant 0 : index
    %c0_20 = arith.constant 0 : index
    %81 = vector.load %arg4[%c0_18, %c0_19, %c0_20] : memref<4x128x8xf32, #tpu.memory_space<vmem>>, vector<1x128x8xf32>
    %82 = vector.shape_cast %81 : vector<1x128x8xf32> to vector<128x8xf32>
    %cst_21 = arith.constant dense<0.000000e+00> : vector<32x8xf32>
    %83 = tpu.matmul %80, %82, %cst_21 {dimension_numbers = #tpu.dot_dimension_numbers<[1], [0], [0], [1], [0, 0, 1, 1], [], []>} : vector<32x128xf32>, vector<128x8xf32>, vector<32x8xf32> -> vector<32x8xf32>
    %84 = arith.addf %66, %83 : vector<32x8xf32>
    %85 = vector.broadcast %30 : vector<1x1xf32> to vector<32x128xf32>
    %86 = arith.mulf %85, %62 : vector<32x128xf32>
    %87 = vector.broadcast %32 : vector<1x1xf32> to vector<32x128xf32>
    %88 = arith.mulf %87, %59 : vector<32x128xf32>
    %89 = arith.addf %86, %88 : vector<32x128xf32>
    %90 = vector.broadcast %34 : vector<1x1xf32> to vector<32x128xf32>
    %91 = arith.mulf %90, %65 : vector<32x128xf32>
    %92 = arith.addf %89, %91 : vector<32x128xf32>
    %93 = vector.broadcast %36 : vector<1x1xf32> to vector<32x128xf32>
    %94 = arith.addf %92, %93 : vector<32x128xf32>
    %cst_22 = arith.constant 0.000000e+00 : f32
    %95 = vector.broadcast %cst_22 : f32 to vector<32x128xf32>
    %96 = arith.maximumf %94, %95 : vector<32x128xf32>
    %c127_i32_23 = arith.constant 127 : i32
    %97 = tpu.dynamic_rotate %96 by %c127_i32_23 dim 1 : vector<32x128xf32>, i32 -> vector<32x128xf32>
    %98 = arith.maximumf %96, %97 : vector<32x128xf32>
    %c1_24 = arith.constant 1 : index
    %c0_25 = arith.constant 0 : index
    %c0_26 = arith.constant 0 : index
    %99 = vector.load %arg4[%c1_24, %c0_25, %c0_26] : memref<4x128x8xf32, #tpu.memory_space<vmem>>, vector<1x128x8xf32>
    %100 = vector.shape_cast %99 : vector<1x128x8xf32> to vector<128x8xf32>
    %cst_27 = arith.constant dense<0.000000e+00> : vector<32x8xf32>
    %101 = tpu.matmul %98, %100, %cst_27 {dimension_numbers = #tpu.dot_dimension_numbers<[1], [0], [0], [1], [0, 0, 1, 1], [], []>} : vector<32x128xf32>, vector<128x8xf32>, vector<32x8xf32> -> vector<32x8xf32>
    %102 = arith.addf %84, %101 : vector<32x8xf32>
    %103 = vector.broadcast %38 : vector<1x1xf32> to vector<32x128xf32>
    %104 = arith.mulf %103, %62 : vector<32x128xf32>
    %105 = vector.broadcast %40 : vector<1x1xf32> to vector<32x128xf32>
    %106 = arith.mulf %105, %59 : vector<32x128xf32>
    %107 = arith.addf %104, %106 : vector<32x128xf32>
    %108 = vector.broadcast %42 : vector<1x1xf32> to vector<32x128xf32>
    %109 = arith.mulf %108, %65 : vector<32x128xf32>
    %110 = arith.addf %107, %109 : vector<32x128xf32>
    %111 = vector.broadcast %44 : vector<1x1xf32> to vector<32x128xf32>
    %112 = arith.addf %110, %111 : vector<32x128xf32>
    %cst_28 = arith.constant 0.000000e+00 : f32
    %113 = vector.broadcast %cst_28 : f32 to vector<32x128xf32>
    %114 = arith.maximumf %112, %113 : vector<32x128xf32>
    %c127_i32_29 = arith.constant 127 : i32
    %115 = tpu.dynamic_rotate %114 by %c127_i32_29 dim 1 : vector<32x128xf32>, i32 -> vector<32x128xf32>
    %116 = arith.maximumf %114, %115 : vector<32x128xf32>
    %c2_30 = arith.constant 2 : index
    %c0_31 = arith.constant 0 : index
    %c0_32 = arith.constant 0 : index
    %117 = vector.load %arg4[%c2_30, %c0_31, %c0_32] : memref<4x128x8xf32, #tpu.memory_space<vmem>>, vector<1x128x8xf32>
    %118 = vector.shape_cast %117 : vector<1x128x8xf32> to vector<128x8xf32>
    %cst_33 = arith.constant dense<0.000000e+00> : vector<32x8xf32>
    %119 = tpu.matmul %116, %118, %cst_33 {dimension_numbers = #tpu.dot_dimension_numbers<[1], [0], [0], [1], [0, 0, 1, 1], [], []>} : vector<32x128xf32>, vector<128x8xf32>, vector<32x8xf32> -> vector<32x8xf32>
    %120 = arith.addf %102, %119 : vector<32x8xf32>
    %121 = vector.broadcast %46 : vector<1x1xf32> to vector<32x128xf32>
    %122 = arith.mulf %121, %62 : vector<32x128xf32>
    %123 = vector.broadcast %48 : vector<1x1xf32> to vector<32x128xf32>
    %124 = arith.mulf %123, %59 : vector<32x128xf32>
    %125 = arith.addf %122, %124 : vector<32x128xf32>
    %126 = vector.broadcast %50 : vector<1x1xf32> to vector<32x128xf32>
    %127 = arith.mulf %126, %65 : vector<32x128xf32>
    %128 = arith.addf %125, %127 : vector<32x128xf32>
    %129 = vector.broadcast %52 : vector<1x1xf32> to vector<32x128xf32>
    %130 = arith.addf %128, %129 : vector<32x128xf32>
    %cst_34 = arith.constant 0.000000e+00 : f32
    %131 = vector.broadcast %cst_34 : f32 to vector<32x128xf32>
    %132 = arith.maximumf %130, %131 : vector<32x128xf32>
    %c127_i32_35 = arith.constant 127 : i32
    %133 = tpu.dynamic_rotate %132 by %c127_i32_35 dim 1 : vector<32x128xf32>, i32 -> vector<32x128xf32>
    %134 = arith.maximumf %132, %133 : vector<32x128xf32>
    %c3_36 = arith.constant 3 : index
    %c0_37 = arith.constant 0 : index
    %c0_38 = arith.constant 0 : index
    %135 = vector.load %arg4[%c3_36, %c0_37, %c0_38] : memref<4x128x8xf32, #tpu.memory_space<vmem>>, vector<1x128x8xf32>
    %136 = vector.shape_cast %135 : vector<1x128x8xf32> to vector<128x8xf32>
    %cst_39 = arith.constant dense<0.000000e+00> : vector<32x8xf32>
    %137 = tpu.matmul %134, %136, %cst_39 {dimension_numbers = #tpu.dot_dimension_numbers<[1], [0], [0], [1], [0, 0, 1, 1], [], []>} : vector<32x128xf32>, vector<128x8xf32>, vector<32x8xf32> -> vector<32x8xf32>
    %138 = arith.addf %120, %137 : vector<32x8xf32>
    %139 = vector.broadcast %53 : f32 to vector<32x8xf32>
    %140 = arith.addf %138, %139 : vector<32x8xf32>
    %141 = arith.index_cast %57 : i32 to index
    %c0_40 = arith.constant 0 : index
    %142 = vector.load %arg6[%141, %c0_40] : memref<32x8xf32, #tpu.memory_space<vmem>>, vector<32x8xf32>
    tpu.vector_store %arg6[%141, %c0_40], %140 {strides = array<i32>} : memref<32x8xf32, #tpu.memory_space<vmem>>, vector<32x8xf32>,
    %c1_i32_41 = arith.constant 1 : i32
    return
  }
  func.func @transform_0(%arg0: i32) -> (i32, i32) {
    %c0_i32 = arith.constant 0 : i32
    %c0_i32_0 = arith.constant 0 : i32
    return %arg0, %c0_i32 : i32, i32
  }
  func.func @transform_1(%arg0: i32) -> i32 {
    %c0_i32 = arith.constant 0 : i32
    %c0_i32_0 = arith.constant 0 : i32
    return %c0_i32 : i32
  }
  func.func @transform_2(%arg0: i32) -> i32 {
    %c0_i32 = arith.constant 0 : i32
    %c0_i32_0 = arith.constant 0 : i32
    return %c0_i32 : i32
  }
  func.func @transform_3(%arg0: i32) -> (i32, i32, i32) {
    %c0_i32 = arith.constant 0 : i32
    %c0_i32_0 = arith.constant 0 : i32
    %c0_i32_1 = arith.constant 0 : i32
    %c0_i32_2 = arith.constant 0 : i32
    return %c0_i32, %c0_i32_0, %c0_i32_1 : i32, i32, i32
  }
  func.func @transform_4(%arg0: i32) -> i32 {
    %c0_i32 = arith.constant 0 : i32
    %c0_i32_0 = arith.constant 0 : i32
    return %c0_i32 : i32
  }
  func.func @transform_5(%arg0: i32) -> (i32, i32) {
    %c0_i32 = arith.constant 0 : i32
    %c0_i32_0 = arith.constant 0 : i32
    return %arg0, %c0_i32 : i32, i32
  }
}

</mosaic_0001>

<bundles_post_ra>
// kernel: tpu_custom_call.1
= control target key start
LH: loop header
LB: loop body
LE: loop exit
PB: predicated region body
PF: predicated region fallthrough
CT: control target
= control target key end

     0   :  { %11 = vsyncpa [#allocation4], 0  ;;  %s1616_s0 = inlined_call_operand.vmem [shape: f32[32,128], index: 0, kind: input, shape index: {}]   ;;  %s1617_s1 = inlined_call_operand.vmem [shape: f32[12], index: 1, kind: input, shape index: {}]   ;;  %s1618_s2 = inlined_call_operand.vmem [shape: f32[4], index: 2, kind: input, shape index: {}]   ;;  %s1619_s3 = inlined_call_operand.vmem [shape: f32[4,128,8], index: 3, kind: input, shape index: {}]   ;;  %s1620_s4 = inlined_call_operand.<no memory space> [shape: f32[1], index: 4, kind: input, shape index: {}]   ;;  %s1621_s5 = inlined_call_operand.vmem [shape: f32[32,8], index: 5, kind: output, shape index: {}]  }
   0x1   :  { %s21_s20 = sshll.u32 %s1617_s1, 4  ;;  %s22_s20 = int_to_ptr.vmem [resolvable:$true] %s21_s20 }
   0x2   :  { %12 = vsyncpa [#allocation6], 0  ;;  %s31_s23 = sshll.u32 %s1618_s2, 4  ;;  %s1052_s24 = scalar_lea.vmem %s22_s20, 16  ;;  %s32_s23 = int_to_ptr.vmem [resolvable:$true] %s31_s23 }
   0x3   :  { %p1053_p0 = scmp.ne.s32.totalorder %s22_s20, %s1052_s24  ;;  %p1057_p1 = scmp.lt.s32.totalorder %s22_s20, %s22_s20 }
   0x4   :  { %p1058_p2 = scmp.lt.s32.totalorder %s1052_s24, %s1052_s24 }
   0x6   :  { %p1059_p3 = por %p1058_p2, %p1057_p1 }
   0x8   :  { %p1060_p4 = pnand %p1059_p3, %p1053_p0 }
   0xa   :  { %1063 = shalt.err (!%p1060_p4)
}
   0xb   :  { %s1080_s25 = smov [#allocation3]   ;;  %s1064_s26 = scalar_lea.vmem %s32_s23, 16 }
   0xc   :  { %24 = dma.vmem_to_smem %s22_s20, 16, %s1080_s25, [#allocation4]  }
   0xd   :  { %p1065_p5 = scmp.ne.s32.totalorder %s32_s23, %s1064_s26  ;;  %p1069_p6 = scmp.lt.s32.totalorder %s32_s23, %s32_s23 }
   0xe   :  { %p1070_p7 = scmp.lt.s32.totalorder %s1064_s26, %s1064_s26 }
  0x10   :  { %p1071_p8 = por %p1070_p7, %p1069_p6 }
  0x12   :  { %p1072_p9 = pnand %p1071_p8, %p1065_p5 }
  0x14   :  { %1075 = shalt.err (!%p1072_p9)
}
  0x15   :  { %s1081_s1 = smov [#allocation5]  }
  0x16   :  { %34 = dma.vmem_to_smem %s32_s23, 16, %s1081_s1, [#allocation6]  }
  0x17   :  { %1076 = dma.done.wait [#allocation4], 16  }
  0x18   :  { %1077 = vsyncadd [#allocation4], 4294967280 }
  0x19   :  { %1078 = dma.done.wait [#allocation6], 16  }
  0x1a   :  { %1079 = vsyncadd [#allocation6], 4294967280 }
  0x1b   :  { %45 = sfence }
  0x1c   :  { %v1123_v0 = vld [vmem:[%s1616_s0] sm:$0xff]  ;;  %s1082_s28 = smov 127   ;;  %s1083_s29 = smov 1   ;;  %v1131_v1 = vld [vmem:[%s1616_s0 + $0x8] sm:$0xff]  ;;  %v1139_v2 = vld [vmem:[%s1616_s0 + $0x18] sm:$0xff]  ;;  %v46_v32 = vlaneseq  ;;  %vm703_vm2 = vcmask 64512  }
  0x1d   :  { %95 = vrot.lane.b32.xlu1 %v1123_v0, %s1082_s28  ;;  %83 = vrot.lane.b32.xlu0 %v1123_v0, %s1083_s29  ;;  %v1144_v3 = vld [vmem:[%s1616_s0 + $0x10] sm:$0xff]  ;;  %v743_v4 = vld [vmem:[%s1619_s3 + $0xf8] sm:$0xff]  ;;  %s715_s13 = sld [smem:[#allocation3 + $0x2]] }
  0x1e   :  { %v166_v5 = vld [vmem:[%s1619_s3 + $0x78] sm:$0xff]  ;;  %v742_v6 = vld [vmem:[%s1619_s3 + $0xf0] sm:$0xff]  ;;  %856 = vmatprep.subr.mxu0 %v743_v4  ;;  %v741_v8 = vld [vmem:[%s1619_s3 + $0xe8] sm:$0xff]  ;;  %s718_s14 = sld [smem:[#allocation3 + $0x5]]  ;;  %v47_v33 = vand.u32 127, %v46_v32 }
  0x1f   :  { %894 = vmatprep.subr.mxu1 %v166_v5  ;;  %v165_v7 = vld [vmem:[%s1619_s3 + $0x70] sm:$0xff]  ;;  %857 = vmatpush3.msra.mxu0 %v743_v4  ;;  %v164_v9 = vld [vmem:[%s1619_s3 + $0x68] sm:$0xff]  ;;  %v740_v10 = vld [vmem:[%s1619_s3 + $0xe0] sm:$0xff]  ;;  %s722_s0 = sld [smem:[#allocation3 + $0x8]] }
  0x20   :  { %895 = vmatpush3.msra.mxu1 %v166_v5  ;;  %858 = vmatprep.subr.mxu0 %v742_v6  ;;  %v163_v11 = vld [vmem:[%s1619_s3 + $0x60] sm:$0xff]  ;;  %v739_v12 = vld [vmem:[%s1619_s3 + $0xd8] sm:$0xff]  ;;  %v738_v14 = vld [vmem:[%s1619_s3 + $0xd0] sm:$0xff]  ;;  %s726_s15 = sld [smem:[#allocation3 + $0xb]]  ;;  %v52_v34 = vand.u32 15, %v47_v33 }
  0x21   :  { %97 = vrot.lane.b32.xlu1 %v1131_v1, %s1082_s28  ;;  %85 = vrot.lane.b32.xlu0 %v1131_v1, %s1083_s29  ;;  %v162_v13 = vld [vmem:[%s1619_s3 + $0x58] sm:$0xff]  ;;  %v161_v15 = vld [vmem:[%s1619_s3 + $0x50] sm:$0xff]  ;;  %s62_s16 = sld [smem:[#allocation3]] }
  0x22   :  { %896 = vmatprep.subr.mxu1 %v165_v7  ;;  %859 = vmatpush3.msra.mxu0 %v742_v6  ;;  %v737_v16 = vld [vmem:[%s1619_s3 + $0xc8] sm:$0xff]  ;;  %v736_v18 = vld [vmem:[%s1619_s3 + $0xc0] sm:$0xff]  ;;  %v735_v20 = vld [vmem:[%s1619_s3 + $0xb8] sm:$0xff]  ;;  %s714_s17 = sld [smem:[#allocation3 + $0x1]]  ;;  %vm1236_vm0 = vcmp.eq.s32.totalorder %v52_v34, 15  ;;  %vm1240_vm1 = vcmp.eq.s32.totalorder %v52_v34, 0 }
  0x23   :  { %897 = vmatpush3.msra.mxu1 %v165_v7  ;;  %860 = vmatprep.subr.mxu0 %v741_v8  ;;  %v160_v17 = vld [vmem:[%s1619_s3 + $0x48] sm:$0xff]  ;;  %v159_v19 = vld [vmem:[%s1619_s3 + $0x40] sm:$0xff]  ;;  %v158_v21 = vld [vmem:[%s1619_s3 + $0x38] sm:$0xff]  ;;  %s717_s18 = sld [smem:[#allocation3 + $0x4]]  ;;  %v1246_v39 = vstv %s715_s13 }
  0x24   :  { %898 = vmatprep.subr.mxu1 %v164_v9  ;;  %861 = vmatpush3.msra.mxu0 %v741_v8  ;;  %v734_v22 = vld [vmem:[%s1619_s3 + $0xb0] sm:$0xff]  ;;  %v733_v24 = vld [vmem:[%s1619_s3 + $0xa8] sm:$0xff]  ;;  %v732_v26 = vld [vmem:[%s1619_s3 + $0xa0] sm:$0xff]  ;;  %s716_s19 = sld [smem:[#allocation3 + $0x3]]  ;;  %v1248_v40 = vstv %s718_s14 }
  0x25   :  { %89 = vrot.lane.b32.xlu1 %v1139_v2, %s1083_s29  ;;  %87 = vrot.lane.b32.xlu0 %v1144_v3, %s1083_s29  ;;  %v157_v23 = vld [vmem:[%s1619_s3 + $0x30] sm:$0xff]  ;;  %v156_v25 = vld [vmem:[%s1619_s3 + $0x28] sm:$0xff]  ;;  %s721_s20 = sld [smem:[#allocation3 + $0x7]] }
  0x26   :  { %899 = vmatpush3.msra.mxu1 %v164_v9  ;;  %862 = vmatprep.subr.mxu0 %v740_v10  ;;  %v155_v27 = vld [vmem:[%s1619_s3 + $0x20] sm:$0xff]  ;;  %v731_v28 = vld [vmem:[%s1619_s3 + $0x98] sm:$0xff]  ;;  %v730_v30 = vld [vmem:[%s1619_s3 + $0x90] sm:$0xff]  ;;  %s720_s21 = sld [smem:[#allocation3 + $0x6]]  ;;  %v1250_v41 = vstv %s722_s0 }
  0x27   :  { %900 = vmatprep.subr.mxu1 %v163_v11  ;;  %863 = vmatpush3.msra.mxu0 %v740_v10  ;;  %v154_v29 = vld [vmem:[%s1619_s3 + $0x18] sm:$0xff]  ;;  %v153_v31 = vld [vmem:[%s1619_s3 + $0x10] sm:$0xff]  ;;  %s725_s22 = sld [smem:[#allocation3 + $0xa]]  ;;  %v1252_v42 = vstv %s726_s15  ;;  %v1256_v43 = vstv %s62_s16 }
  0x28   :  { %901 = vmatpush3.msra.mxu1 %v163_v11  ;;  %864 = vmatprep.subr.mxu0 %v739_v12  ;;  %s724_s23 = sld [smem:[#allocation3 + $0x9]]  ;;  %v112_v35 = vstv %s714_s17 }
  0x29   :  { %101 = vrot.lane.b32.xlu1 %v1139_v2, %s1082_s28  ;;  %99 = vrot.lane.b32.xlu0 %v1144_v3, %s1082_s28  ;;  %v172_v38 = vstv %s717_s18  ;;  %s1244_s24 = sld [smem:[#allocation5 + $0x1]]  ;;  %v113_v44 = vmul.f32 %v112_v35, %v1123_v0  ;;  %v114_v48 = vmul.f32 %v112_v35, %v1131_v1  ;;  %v1264_v49 = vmul.f32 %v112_v35, %v1139_v2 }
  0x2a   :  { %902 = vmatprep.subr.mxu1 %v162_v13  ;;  %865 = vmatpush3.msra.mxu0 %v739_v12  ;;  %s1254_s25 = sld [smem:[#allocation5]]  ;;  %v1259_v45 = vstv %s716_s19  ;;  %v173_v47 = vmul.f32 %v172_v38, %v1123_v0  ;;  %v1267_v50 = vmul.f32 %v112_v35, %v1144_v3  ;;  %v174_v53 = vmul.f32 %v172_v38, %v1131_v1 }
  0x2b   :  { %903 = vmatpush3.msra.mxu1 %v162_v13  ;;  %866 = vmatprep.subr.mxu0 %v738_v14  ;;  %v403_v46 = vstv %s721_s20  ;;  %v1271_v54 = vmul.f32 %v172_v38, %v1139_v2  ;;  %v175_v60 = vmul.f32 %v172_v38, %v1144_v3  ;;  %s1334_s26 = sld [smem:[#allocation5 + $0x2]] }
  0x2c   :  { %904 = vmatprep.subr.mxu1 %v161_v15  ;;  %867 = vmatpush3.msra.mxu0 %v738_v14  ;;  %v398_v51 = vstv %s720_s21  ;;  %v404_v57 = vmul.f32 %v403_v46, %v1123_v0  ;;  %v405_v59 = vmul.f32 %v403_v46, %v1131_v1  ;;  %v407_v63 = vmul.f32 %v403_v46, %v1139_v2  ;;  %s1354_s1 = sld [smem:[#allocation5 + $0x3]] }
  0x2d   :  { %905 = vmatpush3.msra.mxu1 %v161_v15  ;;  %868 = vmatprep.subr.mxu0 %v737_v16  ;;  %v553_v52 = vstv %s725_s22  ;;  %v406_v4 = vmul.f32 %v403_v46, %v1144_v3 }
  0x2e   :  { %906 = vmatprep.subr.mxu1 %v160_v17  ;;  %869 = vmatpush3.msra.mxu0 %v737_v16  ;;  %v548_v58 = vstv %s724_s23  ;;  %v554_v5 = vmul.f32 %v553_v52, %v1123_v0  ;;  %v555_v6 = vmul.f32 %v553_v52, %v1131_v1  ;;  %v557_v7 = vmul.f32 %v553_v52, %v1139_v2 }
  0x2f   :  { %907 = vmatpush3.msra.mxu1 %v160_v17  ;;  %870 = vmatprep.subr.mxu0 %v736_v18  ;;  %v556_v8 = vmul.f32 %v553_v52, %v1144_v3  ;;  %v1291_v17 = vstv %s1244_s24 }
  0x30   :  { %908 = vmatprep.subr.mxu1 %v159_v19  ;;  %871 = vmatpush3.msra.mxu0 %v736_v18  ;;  %v1294_v0 = vstv %s1254_s25 }
  0x31   :  { %909 = vmatpush3.msra.mxu1 %v159_v19  ;;  %872 = vmatprep.subr.mxu0 %v735_v20 }
  0x32   :  { %910 = vmatprep.subr.mxu1 %v158_v21  ;;  %873 = vmatpush3.msra.mxu0 %v735_v20 }
  0x33   :  { %911 = vmatpush3.msra.mxu1 %v158_v21  ;;  %874 = vmatprep.subr.mxu0 %v734_v22 }
  0x34   :  { %912 = vmatprep.subr.mxu1 %v157_v23  ;;  %875 = vmatpush3.msra.mxu0 %v734_v22 }
  0x35   :  { %913 = vmatpush3.msra.mxu1 %v157_v23  ;;  %876 = vmatprep.subr.mxu0 %v733_v24 }
  0x36   :  { %914 = vmatprep.subr.mxu1 %v156_v25  ;;  %877 = vmatpush3.msra.mxu0 %v733_v24 }
  0x37   :  { %915 = vmatpush3.msra.mxu1 %v156_v25  ;;  %878 = vmatprep.subr.mxu0 %v732_v26 }
  0x38   :  { %916 = vmatprep.subr.mxu1 %v155_v27  ;;  %879 = vmatpush3.msra.mxu0 %v732_v26 }
  0x39   :  { %917 = vmatpush3.msra.mxu1 %v155_v27  ;;  %880 = vmatprep.subr.mxu0 %v731_v28 }
  0x3a   :  { %918 = vmatprep.subr.mxu1 %v154_v29  ;;  %881 = vmatpush3.msra.mxu0 %v731_v28 }
  0x3b   :  { %919 = vmatpush3.msra.mxu1 %v154_v29  ;;  %882 = vmatprep.subr.mxu0 %v730_v30 }
  0x3c   :  { %920 = vmatprep.subr.mxu1 %v153_v31  ;;  %883 = vmatpush3.msra.mxu0 %v730_v30 }
  0x3d   :  { %921 = vmatpush3.msra.mxu1 %v153_v31 }
  0x8f   :  { %v96_v55 = vpop.permute.xlu1 %95  ;;  %v84_v56 = vpop.permute.xlu0 %83 }
  0x90   :  { %v103_v61 = vsel %vm1236_vm0, 0.0, %v96_v55  ;;  %v91_v62 = vsel %vm1240_vm1, 0.0, %v84_v56 }
  0x91   :  { %v108_v9 = vmul.f32 %v1256_v43, %v91_v62  ;;  %v168_v10 = vmul.f32 %v1259_v45, %v91_v62  ;;  %v399_v11 = vmul.f32 %v398_v51, %v91_v62  ;;  %v549_v12 = vmul.f32 %v548_v58, %v91_v62 }
  0x92   :  { %v122_v13 = vmul.f32 %v1246_v39, %v103_v61  ;;  %v182_v14 = vmul.f32 %v1248_v40, %v103_v61  ;;  %v1297_v1 = vmul.f32 %v1250_v41, %v103_v61  ;;  %v1300_v2 = vmul.f32 %v1252_v42, %v103_v61 }
  0x93   :  { %v98_v15 = vpop.permute.xlu1 %97  ;;  %v86_v16 = vpop.permute.xlu0 %85  ;;  %v117_v3 = vadd.f32 %v113_v44, %v108_v9  ;;  %v177_v18 = vadd.f32 %v173_v47, %v168_v10  ;;  %v1302_v19 = vadd.f32 %v404_v57, %v399_v11  ;;  %v1304_v20 = vadd.f32 %v554_v5, %v549_v12 }
  0x94   :  { %v104_v21 = vsel %vm1236_vm0, 0.0, %v98_v15  ;;  %v92_v22 = vsel %vm1240_vm1, 0.0, %v86_v16  ;;  %v152_v16 = vld [vmem:[%s1619_s3 + $0x8] sm:$0xff] }
  0x95   :  { %v1311_v23 = vmul.f32 %v1246_v39, %v104_v21  ;;  %v183_v24 = vmul.f32 %v1248_v40, %v104_v21  ;;  %v1315_v25 = vmul.f32 %v1250_v41, %v104_v21  ;;  %v1318_v26 = vmul.f32 %v1252_v42, %v104_v21  ;;  %922 = vmatprep.subr.mxu1 %v152_v16 }
  0x96   :  { %v109_v27 = vmul.f32 %v1256_v43, %v92_v22  ;;  %v169_v28 = vmul.f32 %v1259_v45, %v92_v22  ;;  %v400_v29 = vmul.f32 %v398_v51, %v92_v22  ;;  %v550_v30 = vmul.f32 %v548_v58, %v92_v22  ;;  %923 = vmatpush3.msra.mxu1 %v152_v16 }
  0x97   :  { %v90_v31 = vpop.permute.xlu1 %89  ;;  %v88_v32 = vpop.permute.xlu0 %87  ;;  %v186_v35 = vadd.f32 %v182_v14, %v177_v18  ;;  %v126_v38 = vadd.f32 %v122_v13, %v117_v3 }
  0x98   :  { %v94_v33 = vsel %vm1240_vm1, 0.0, %v90_v31  ;;  %v93_v34 = vsel %vm1240_vm1, 0.0, %v88_v32  ;;  %v118_v44 = vadd.f32 %v114_v48, %v109_v27  ;;  %v178_v46 = vadd.f32 %v174_v53, %v169_v28  ;;  %v151_v27 = vld [vmem:[%s1619_s3] sm:$0xff]  ;;  %v1379_v32 = vld [vmem:[%s1619_s3 + $0x178] sm:$0xff] }
  0x99   :  { %v1326_v47 = vadd.f32 %v405_v59, %v400_v29  ;;  %v1328_v52 = vadd.f32 %v555_v6, %v550_v30  ;;  %v111_v55 = vmul.f32 %v1256_v43, %v94_v33  ;;  %v171_v56 = vmul.f32 %v1259_v45, %v94_v33  ;;  %924 = vmatprep.subr.mxu1 %v151_v27 }
  0x9a   :  { %v402_v57 = vmul.f32 %v398_v51, %v94_v33  ;;  %v552_v61 = vmul.f32 %v548_v58, %v94_v33  ;;  %v110_v62 = vmul.f32 %v1256_v43, %v93_v34  ;;  %v170_v5 = vmul.f32 %v1259_v45, %v93_v34  ;;  %925 = vmatpush3.msra.mxu1 %v151_v27 }
  0x9b   :  { %v401_v37 = vmul.f32 %v398_v51, %v93_v34  ;;  %v551_v9 = vmul.f32 %v548_v58, %v93_v34  ;;  %v102_v10 = vpop.permute.xlu1 %101  ;;  %v100_v11 = vpop.permute.xlu0 %99  ;;  %v120_v48 = vadd.f32 %v1264_v49, %v111_v55  ;;  %v180_v53 = vadd.f32 %v1271_v54, %v171_v56 }
  0x9c   :  { %v411_v59 = vadd.f32 %v407_v63, %v402_v57  ;;  %v561_v6 = vadd.f32 %v557_v7, %v552_v61  ;;  %v119_v12 = vadd.f32 %v1267_v50, %v110_v62  ;;  %v179_v13 = vadd.f32 %v175_v60, %v170_v5 }
  0x9d   :  { %v410_v14 = vadd.f32 %v406_v4, %v401_v37  ;;  %v560_v15 = vadd.f32 %v556_v8, %v551_v9  ;;  %v106_v43 = vsel %vm1236_vm0, 0.0, %v102_v10  ;;  %v105_v45 = vsel %vm1236_vm0, 0.0, %v100_v11  ;;  %v729_v8 = vld [vmem:[%s1619_s3 + $0x88] sm:$0xff] }
  0x9e   :  { %v187_v51 = vadd.f32 %v183_v24, %v178_v46  ;;  %v1344_v58 = vadd.f32 %v1291_v17, %v186_v35  ;;  %v125_v49 = vmul.f32 %v1246_v39, %v106_v43  ;;  %v185_v54 = vmul.f32 %v1248_v40, %v106_v43  ;;  %884 = vmatprep.subr.mxu0 %v729_v8 }
  0x9f   :  { %v416_v63 = vmul.f32 %v1250_v41, %v106_v43  ;;  %v566_v50 = vmul.f32 %v1252_v42, %v106_v43  ;;  %v124_v60 = vmul.f32 %v1246_v39, %v105_v45  ;;  %v184_v4 = vmul.f32 %v1248_v40, %v105_v45  ;;  %v728_v40 = vld [vmem:[%s1619_s3 + $0x80] sm:$0xff]  ;;  %885 = vmatpush3.msra.mxu0 %v729_v8 }
  0xa0   :  { %v415_v7 = vmul.f32 %v1250_v41, %v105_v45  ;;  %v565_v36 = vmul.f32 %v1252_v42, %v105_v45  ;;  %v129_v3 = vadd.f32 %v125_v49, %v120_v48  ;;  %v189_v18 = vadd.f32 %v185_v54, %v180_v53  ;;  %886 = vmatprep.subr.mxu0 %v728_v40 }
  0xa1   :  { %v420_v39 = vadd.f32 %v416_v63, %v411_v59  ;;  %v570_v21 = vadd.f32 %v566_v50, %v561_v6  ;;  %v128_v41 = vadd.f32 %v124_v60, %v119_v12  ;;  %v188_v42 = vadd.f32 %v184_v4, %v179_v13  ;;  %887 = vmatpush3.msra.mxu0 %v728_v40 }
  0xa2   :  { %v419_v22 = vadd.f32 %v415_v7, %v410_v14  ;;  %v569_v24 = vadd.f32 %v565_v36, %v560_v15  ;;  %v1369_v28 = vadd.f32 %v1291_v17, %v187_v51  ;;  %v127_v29 = vadd.f32 %v1311_v23, %v118_v44  ;;  %932 = vmatprep.subr.mxu0 %v1379_v32 }
  0xa3   :  { %v1373_v30 = vadd.f32 %v1294_v0, %v126_v38  ;;  %v421_v31 = vstv %s1334_s26  ;;  %v1382_v33 = vadd.f32 %v1291_v17, %v188_v42  ;;  %v1385_v34 = vadd.f32 %v1291_v17, %v189_v18  ;;  %v1396_v38 = vld [vmem:[%s1619_s3 + $0x1f8] sm:$0xff]  ;;  %v758_v42 = vld [vmem:[%s1619_s3 + $0x170] sm:$0xff] }
  0xa4   :  { %v1388_v35 = vadd.f32 %v1294_v0, %v128_v41  ;;  %v1391_v23 = vadd.f32 %v1294_v0, %v129_v3  ;;  %v195_v44 = vmax.f32 %v1344_v58, 0.0  ;;  %v196_v46 = vmax.f32 %v1369_v28, 0.0  ;;  %970 = vmatprep.subr.mxu1 %v1396_v38 }
  0xa5   :  { %v132_v55 = vadd.f32 %v1294_v0, %v127_v29  ;;  %v417_v17 = vadd.f32 %v1297_v1, %v1302_v19  ;;  %v197_v56 = vmax.f32 %v1382_v33, 0.0  ;;  %v198_v57 = vmax.f32 %v1385_v34, 0.0  ;;  %v774_v29 = vld [vmem:[%s1619_s3 + $0x1f0] sm:$0xff]  ;;  %v755_v34 = vld [vmem:[%s1619_s3 + $0x158] sm:$0xff] }
  0xa6   :  { %v137_v61 = vmax.f32 %v1388_v35, 0.0  ;;  %v138_v62 = vmax.f32 %v1391_v23, 0.0  ;;  %v1012_v5 = vpack.i.bf16 %v196_v46, %v195_v44  ;;  %v135_v0 = vmax.f32 %v1373_v30, 0.0  ;;  %v757_v30 = vld [vmem:[%s1619_s3 + $0x168] sm:$0xff]  ;;  %v771_v23 = vld [vmem:[%s1619_s3 + $0x1d8] sm:$0xff] }
  0xa7   :  { %v136_v37 = vmax.f32 %v132_v55, 0.0  ;;  %v418_v1 = vadd.f32 %v1315_v25, %v1326_v47  ;;  %v1412_v19 = vadd.f32 %v421_v31, %v417_v17  ;;  %v567_v9 = vadd.f32 %v1300_v2, %v1304_v20 }
  0xa8   :  { %v568_v10 = vadd.f32 %v1318_v26, %v1328_v52  ;;  %v571_v11 = vstv %s1354_s1  ;;  %1013 = vrot.lane.b32.xlu0 %v1012_v5, %s1082_s28  ;;  %v1022_v53 = vpack.i.bf16 %v198_v57, %v197_v56  ;;  %v1426_v47 = vadd.f32 %v421_v31, %v419_v22  ;;  %v754_v5 = vld [vmem:[%s1619_s3 + $0x150] sm:$0xff] }
  0xa9   :  { %v1017_v48 = vpack.i.bf16 %v136_v37, %v135_v0  ;;  %v1424_v25 = vadd.f32 %v421_v31, %v418_v1  ;;  %v1027_v2 = vpack.i.bf16 %v138_v62, %v137_v61  ;;  %v1434_v26 = vadd.f32 %v421_v31, %v420_v39  ;;  %v769_v1 = vld [vmem:[%s1619_s3 + $0x1c8] sm:$0xff] }
  0xaa   :  { %v1432_v20 = vadd.f32 %v571_v11, %v568_v10  ;;  %v1438_v59 = vadd.f32 %v571_v11, %v567_v9  ;;  %v1440_v6 = vadd.f32 %v571_v11, %v569_v24  ;;  %v1442_v12 = vadd.f32 %v571_v11, %v570_v21  ;;  %v768_v9 = vld [vmem:[%s1619_s3 + $0x1c0] sm:$0xff]  ;;  %v751_v10 = vld [vmem:[%s1619_s3 + $0x138] sm:$0xff] }
  0xab   :  { %1018 = vrot.lane.b32.xlu1 %v1017_v48, %s1082_s28  ;;  %v427_v52 = vmax.f32 %v1424_v25, 0.0  ;;  %v426_v13 = vmax.f32 %v1412_v19, 0.0  ;;  %v428_v15 = vmax.f32 %v1426_v47, 0.0  ;;  %v429_v43 = vmax.f32 %v1434_v26, 0.0  ;;  %v752_v19 = vld [vmem:[%s1619_s3 + $0x140] sm:$0xff]  ;;  %v767_v11 = vld [vmem:[%s1619_s3 + $0x1b8] sm:$0xff] }
  0xac   :  { %1023 = vrot.lane.b32.xlu0 %v1022_v53, %s1082_s28  ;;  %v577_v14 = vmax.f32 %v1432_v20, 0.0  ;;  %v576_v51 = vmax.f32 %v1438_v59, 0.0  ;;  %v578_v58 = vmax.f32 %v1440_v6, 0.0  ;;  %v579_v49 = vmax.f32 %v1442_v12, 0.0  ;;  %v750_v48 = vld [vmem:[%s1619_s3 + $0x130] sm:$0xff]  ;;  %v765_v59 = vld [vmem:[%s1619_s3 + $0x1a8] sm:$0xff] }
  0xad   :  { %v1032_v45 = vpack.i.bf16 %v427_v52, %v426_v13  ;;  %v1042_v63 = vpack.i.bf16 %v429_v43, %v428_v15  ;;  %v766_v53 = vld [vmem:[%s1619_s3 + $0x1b0] sm:$0xff]  ;;  %v698_v26 = vstv %s1620_s4 }
  0xae   :  { %v1037_v54 = vpack.i.bf16 %v577_v14, %v576_v51  ;;  %v1047_v50 = vpack.i.bf16 %v579_v49, %v578_v58 }
  0xaf   :  { %1028 = vrot.lane.b32.xlu1 %v1027_v2, %s1082_s28  ;;  %v749_v2 = vld [vmem:[%s1619_s3 + $0x128] sm:$0xff] }
  0xb0   :  { %1033 = vrot.lane.b32.xlu0 %v1032_v45, %s1082_s28  ;;  %v764_v45 = vld [vmem:[%s1619_s3 + $0x1a0] sm:$0xff] }
  0xb3   :  { %1038 = vrot.lane.b32.xlu1 %v1037_v54, %s1082_s28  ;;  %v763_v54 = vld [vmem:[%s1619_s3 + $0x198] sm:$0xff] }
  0xb4   :  { %1043 = vrot.lane.b32.xlu0 %v1042_v63, %s1082_s28  ;;  %v746_v63 = vld [vmem:[%s1619_s3 + $0x110] sm:$0xff] }
  0xb7   :  { %1048 = vrot.lane.b32.xlu1 %v1047_v50, %s1082_s28  ;;  %v762_v50 = vld [vmem:[%s1619_s3 + $0x190] sm:$0xff] }
 0x11a   :  { %v1014_v60 = vpop.permute.xlu0 %1013 }
 0x11b   :  { %v1016_v4 = vunpack.i.h.bf16 %v1014_v60  ;;  %v1015_v7 = vunpack.i.l.bf16 %v1014_v60 }
 0x11d   :  { %v1019_v36 = vpop.permute.xlu1 %1018  ;;  %v208_v8 = vmax.f32 %v196_v46, %v1016_v4  ;;  %v207_v18 = vmax.f32 %v195_v44, %v1015_v7  ;;  %v773_v46 = vld [vmem:[%s1619_s3 + $0x1e8] sm:$0xff] }
 0x11e   :  { %v1021_v16 = vunpack.i.h.bf16 %v1019_v36  ;;  %v1020_v3 = vunpack.i.l.bf16 %v1019_v36  ;;  %v1024_v39 = vpop.permute.xlu0 %1023  ;;  %v745_v7 = vld [vmem:[%s1619_s3 + $0x108] sm:$0xff] }
 0x11f   :  { %888 = vmatprep.mubr.f32.mxu0 %v207_v18  ;;  %v1025_v41 = vunpack.i.l.bf16 %v1024_v39  ;;  %v1026_v24 = vunpack.i.h.bf16 %v1024_v39  ;;  %v761_v36 = vld [vmem:[%s1619_s3 + $0x188] sm:$0xff]  ;;  %v744_v39 = vld [vmem:[%s1619_s3 + $0x100] sm:$0xff] }
 0x120   :  { %v148_v21 = vmax.f32 %v136_v37, %v1021_v16  ;;  %v147_v40 = vmax.f32 %v135_v0, %v1020_v3  ;;  %889 = vmatmul.mubr.f32.vlgmr.msra.gmra.mxu0 %v208_v8  ;;  %v770_v0 = vld [vmem:[%s1619_s3 + $0x1d0] sm:$0xff]  ;;  %v753_v37 = vld [vmem:[%s1619_s3 + $0x148] sm:$0xff] }
 0x121   :  { %v1029_v22 = vpop.permute.xlu1 %1028  ;;  %933 = vmatpush3.msra.mxu0 %v1379_v32  ;;  %v209_v31 = vmax.f32 %v197_v56, %v1025_v41  ;;  %v210_v33 = vmax.f32 %v198_v57, %v1026_v24  ;;  %v772_v56 = vld [vmem:[%s1619_s3 + $0x1e0] sm:$0xff] }
 0x122   :  { %926 = vmatprep.mubr.f32.mxu1 %v147_v40  ;;  %v1031_v27 = vunpack.i.h.bf16 %v1029_v22  ;;  %v1030_v28 = vunpack.i.l.bf16 %v1029_v22  ;;  %934 = vmatprep.subr.mxu0 %v758_v42  ;;  %v1485_v44 = vpop.permute.xlu0 %1033 }
 0x123   :  { %927 = vmatmul.mubr.f32.vlgmr.msra.gmra.mxu1 %v148_v21  ;;  %935 = vmatpush3.msra.mxu0 %v758_v42  ;;  %v1035_v35 = vunpack.i.l.bf16 %v1485_v44  ;;  %v1036_v8 = vunpack.i.h.bf16 %v1485_v44  ;;  %v760_v21 = vld [vmem:[%s1619_s3 + $0x180] sm:$0xff] }
 0x124   :  { %v149_v32 = vmax.f32 %v137_v61, %v1030_v28  ;;  %971 = vmatpush3.msra.mxu1 %v1396_v38  ;;  %936 = vmatprep.subr.mxu0 %v757_v30  ;;  %v150_v17 = vmax.f32 %v138_v62, %v1031_v27  ;;  %v756_v38 = vld [vmem:[%s1619_s3 + $0x160] sm:$0xff] }
 0x125   :  { %972 = vmatprep.subr.mxu1 %v774_v29  ;;  %v1493_v55 = vpop.permute.xlu1 %1038  ;;  %937 = vmatpush3.msra.mxu0 %v757_v30  ;;  %v438_v57 = vmax.f32 %v426_v13, %v1035_v35  ;;  %v748_v13 = vld [vmem:[%s1619_s3 + $0x120] sm:$0xff]  ;;  %v439_v40 = vmax.f32 %v427_v52, %v1036_v8 }
 0x126   :  { %973 = vmatpush3.msra.mxu1 %v774_v29  ;;  %v1040_v61 = vunpack.i.l.bf16 %v1493_v55  ;;  %891 = vmatprep.mubr.f32.mxu0 %v209_v31  ;;  %v1044_v60 = vpop.permute.xlu0 %1043  ;;  %v1041_v16 = vunpack.i.h.bf16 %v1493_v55 }
 0x127   :  { %974 = vmatprep.subr.mxu1 %v773_v46  ;;  %929 = vmatprep.mubr.f32.mxu1 %v149_v32  ;;  %v1045_v3 = vunpack.i.l.bf16 %v1044_v60  ;;  %v1046_v42 = vunpack.i.h.bf16 %v1044_v60 }
 0x128   :  { %975 = vmatpush3.msra.mxu1 %v773_v46  ;;  %938 = vmatprep.subr.mxu0 %v756_v38  ;;  %v588_v62 = vmax.f32 %v576_v51, %v1040_v61  ;;  %v747_v51 = vld [vmem:[%s1619_s3 + $0x118] sm:$0xff]  ;;  %v589_v41 = vmax.f32 %v577_v14, %v1041_v16 }
 0x129   :  { %976 = vmatprep.subr.mxu1 %v772_v56  ;;  %892 = vmatmul.mubr.f32.gmra.mxu0 %v210_v33  ;;  %v1049_v4 = vpop.permute.xlu1 %1048  ;;  %v440_v24 = vmax.f32 %v428_v15, %v1045_v3  ;;  %v441_v25 = vmax.f32 %v429_v43, %v1046_v42 }
 0x12a   :  { %930 = vmatmul.mubr.f32.gmra.mxu1 %v150_v17  ;;  %939 = vmatpush3.msra.mxu0 %v756_v38  ;;  %v1050_v18 = vunpack.i.l.bf16 %v1049_v4  ;;  %v1051_v22 = vunpack.i.h.bf16 %v1049_v4 }
 0x12b   :  { %977 = vmatpush3.msra.mxu1 %v772_v56  ;;  %940 = vmatprep.subr.mxu0 %v755_v34 }
 0x12c   :  { %978 = vmatprep.subr.mxu1 %v771_v23  ;;  %941 = vmatpush3.msra.mxu0 %v755_v34  ;;  %v590_v27 = vmax.f32 %v578_v58, %v1050_v18  ;;  %v591_v20 = vmax.f32 %v579_v49, %v1051_v22 }
 0x12d   :  { %979 = vmatpush3.msra.mxu1 %v771_v23  ;;  %942 = vmatprep.subr.mxu0 %v754_v5 }
 0x12e   :  { %964 = vmatprep.mubr.f32.mxu0 %v438_v57  ;;  %980 = vmatprep.subr.mxu1 %v770_v0 }
 0x12f   :  { %1002 = vmatprep.mubr.f32.mxu1 %v588_v62  ;;  %943 = vmatpush3.msra.mxu0 %v754_v5 }
 0x130   :  { %981 = vmatpush3.msra.mxu1 %v770_v0  ;;  %944 = vmatprep.subr.mxu0 %v753_v37 }
 0x131   :  { %982 = vmatprep.subr.mxu1 %v769_v1  ;;  %945 = vmatpush3.msra.mxu0 %v753_v37 }
 0x132   :  { %983 = vmatpush3.msra.mxu1 %v769_v1  ;;  %946 = vmatprep.subr.mxu0 %v752_v19 }
 0x133   :  { %984 = vmatprep.subr.mxu1 %v768_v9  ;;  %947 = vmatpush3.msra.mxu0 %v752_v19 }
 0x134   :  { %985 = vmatpush3.msra.mxu1 %v768_v9  ;;  %948 = vmatprep.subr.mxu0 %v751_v10 }
 0x135   :  { %986 = vmatprep.subr.mxu1 %v767_v11  ;;  %949 = vmatpush3.msra.mxu0 %v751_v10 }
 0x136   :  { %987 = vmatpush3.msra.mxu1 %v767_v11  ;;  %950 = vmatprep.subr.mxu0 %v750_v48 }
 0x137   :  { %988 = vmatprep.subr.mxu1 %v766_v53  ;;  %951 = vmatpush3.msra.mxu0 %v750_v48 }
 0x138   :  { %989 = vmatpush3.msra.mxu1 %v766_v53  ;;  %952 = vmatprep.subr.mxu0 %v749_v2 }
 0x139   :  { %990 = vmatprep.subr.mxu1 %v765_v59  ;;  %953 = vmatpush3.msra.mxu0 %v749_v2 }
 0x13a   :  { %991 = vmatpush3.msra.mxu1 %v765_v59  ;;  %954 = vmatprep.subr.mxu0 %v748_v13 }
 0x13b   :  { %992 = vmatprep.subr.mxu1 %v764_v45  ;;  %955 = vmatpush3.msra.mxu0 %v748_v13 }
 0x13c   :  { %993 = vmatpush3.msra.mxu1 %v764_v45  ;;  %956 = vmatprep.subr.mxu0 %v747_v51 }
 0x13d   :  { %994 = vmatprep.subr.mxu1 %v763_v54  ;;  %957 = vmatpush3.msra.mxu0 %v747_v51 }
 0x13e   :  { %995 = vmatpush3.msra.mxu1 %v763_v54  ;;  %958 = vmatprep.subr.mxu0 %v746_v63 }
 0x13f   :  { %996 = vmatprep.subr.mxu1 %v762_v50  ;;  %959 = vmatpush3.msra.mxu0 %v746_v63 }
 0x140   :  { %997 = vmatpush3.msra.mxu1 %v762_v50  ;;  %960 = vmatprep.subr.mxu0 %v745_v7 }
 0x141   :  { %998 = vmatprep.subr.mxu1 %v761_v36  ;;  %961 = vmatpush3.msra.mxu0 %v745_v7 }
 0x142   :  { %999 = vmatpush3.msra.mxu1 %v761_v36  ;;  %962 = vmatprep.subr.mxu0 %v744_v39 }
 0x143   :  { %1000 = vmatprep.subr.mxu1 %v760_v21  ;;  %963 = vmatpush3.msra.mxu0 %v744_v39 }
 0x144   :  { %1001 = vmatpush3.msra.mxu1 %v760_v21  ;;  %965 = vmatmul.mubr.f32.vlgmr.msra.gmra.mxu0 %v439_v40 }
 0x145   :  { %1003 = vmatmul.mubr.f32.vlgmr.msra.gmra.mxu1 %v589_v41  ;;  %967 = vmatprep.mubr.f32.mxu0 %v440_v24 }
 0x146   :  { %1005 = vmatprep.mubr.f32.mxu1 %v590_v27 }
 0x148   :  { %968 = vmatmul.mubr.f32.gmra.mxu0 %v441_v25 }
 0x149   :  { %1006 = vmatmul.mubr.f32.gmra.mxu1 %v591_v20 }
 0x1e0   :  { %v890_v52 = vpop.f32.mrf.mxu0 }
 0x1e2   :  { %v294_v14 = vpop.f32.mrf.mxu0 }
 0x1e3   :  { %v928_v47 = vpop.f32.mrf.mxu1 }
 0x1e4   :  { %v385_v30 = vadd.f32 %v928_v47, %v890_v52 }
 0x1e5   :  { %v379_v15 = vpop.f32.mrf.mxu1 }
 0x1e6   :  { %v380_v32 = vadd.f32 %v379_v15, %v294_v14 }
 0x1e9   :  { %v893_v6 = vpop.f32.mrf.mxu0 }
 0x1ea   :  { %v931_v58 = vpop.f32.mrf.mxu1 }
 0x1eb   :  { %v304_v28 = vpop.f32.mrf.mxu0  ;;  %v395_v49 = vadd.f32 %v931_v58, %v893_v6 }
 0x1ec   :  { %v389_v29 = vpop.f32.mrf.mxu1 }
 0x1ed   :  { %v390_v38 = vadd.f32 %v389_v29, %v304_v28 }
 0x204   :  { %v966_v31 = vpop.f32.mrf.mxu0 }
 0x205   :  { %v1004_v44 = vpop.f32.mrf.mxu1  ;;  %v545_v46 = vadd.f32 %v966_v31, %v385_v30 }
 0x206   :  { %v525_v12 = vpop.f32.mrf.mxu0 }
 0x207   :  { %v675_v43 = vpop.f32.mrf.mxu1  ;;  %v695_v55 = vadd.f32 %v1004_v44, %v545_v46  ;;  %v544_v33 = vadd.f32 %v525_v12, %v380_v32 }
 0x208   :  { %v969_v17 = vpop.f32.mrf.mxu0 }
 0x209   :  { %v1007_v35 = vpop.f32.mrf.mxu1  ;;  %v700_v56 = vadd.f32 %v698_v26, %v695_v55  ;;  %v694_v61 = vadd.f32 %v675_v43, %v544_v33  ;;  %v547_v34 = vadd.f32 %v969_v17, %v395_v49 }
 0x20a   :  { %v535_v23 = vpop.f32.mrf.mxu0 }
 0x20b   :  { %705 = vst.msk [vmem:[%s1621_s5 + $0x8] sm:$0xff] %vm703_vm2, %v700_v56  ;;  %v699_v57 = vadd.f32 %v698_v26, %v694_v61  ;;  %v697_v62 = vadd.f32 %v1007_v35, %v547_v34  ;;  %v546_v5 = vadd.f32 %v535_v23, %v390_v38  ;;  %v685_v0 = vpop.f32.mrf.mxu1 }
 0x20d   :  { %704 = vst.msk [vmem:[%s1621_s5] sm:$0xff] %vm703_vm2, %v699_v57  ;;  %v702_v37 = vadd.f32 %v698_v26, %v697_v62  ;;  %v696_v1 = vadd.f32 %v685_v0, %v546_v5 }
 0x20f   :  { %707 = vst.msk [vmem:[%s1621_s5 + $0x18] sm:$0xff] %vm703_vm2, %v702_v37  ;;  %v701_v19 = vadd.f32 %v698_v26, %v696_v1 }
 0x211   :  { %706 = vst.msk [vmem:[%s1621_s5 + $0x10] sm:$0xff] %vm703_vm2, %v701_v19 }
 0x212   :  { %712 = vsyncpa [#allocation4], 1 }
 0x213   :  { %713 = vsyncpa [#allocation6], 1 }

// kernel: tpu_custom_call.1
= control target key start
LH: loop header
LB: loop body
LE: loop exit
PB: predicated region body
PF: predicated region fallthrough
CT: control target
= control target key end

     0   :  { %11 = vsyncpa [#allocation4], 0  ;;  %s1616_s0 = inlined_call_operand.vmem [shape: f32[32,128], index: 0, kind: input, shape index: {}]   ;;  %s1617_s1 = inlined_call_operand.vmem [shape: f32[12], index: 1, kind: input, shape index: {}]   ;;  %s1618_s2 = inlined_call_operand.vmem [shape: f32[4], index: 2, kind: input, shape index: {}]   ;;  %s1619_s3 = inlined_call_operand.vmem [shape: f32[4,128,8], index: 3, kind: input, shape index: {}]   ;;  %s1620_s4 = inlined_call_operand.<no memory space> [shape: f32[1], index: 4, kind: input, shape index: {}]   ;;  %s1621_s5 = inlined_call_operand.vmem [shape: f32[32,8], index: 5, kind: output, shape index: {}]  }
   0x1   :  { %s21_s20 = sshll.u32 %s1617_s1, 4  ;;  %s22_s20 = int_to_ptr.vmem [resolvable:$true] %s21_s20 }
   0x2   :  { %12 = vsyncpa [#allocation6], 0  ;;  %s31_s23 = sshll.u32 %s1618_s2, 4  ;;  %s1052_s24 = scalar_lea.vmem %s22_s20, 16  ;;  %s32_s23 = int_to_ptr.vmem [resolvable:$true] %s31_s23 }
   0x3   :  { %p1053_p0 = scmp.ne.s32.totalorder %s22_s20, %s1052_s24  ;;  %p1057_p1 = scmp.lt.s32.totalorder %s22_s20, %s22_s20 }
   0x4   :  { %p1058_p2 = scmp.lt.s32.totalorder %s1052_s24, %s1052_s24 }
   0x6   :  { %p1059_p3 = por %p1058_p2, %p1057_p1 }
   0x8   :  { %p1060_p4 = pnand %p1059_p3, %p1053_p0 }
   0xa   :  { %1063 = shalt.err (!%p1060_p4)
}
   0xb   :  { %s1080_s25 = smov [#allocation3]   ;;  %s1064_s26 = scalar_lea.vmem %s32_s23, 16 }
   0xc   :  { %24 = dma.vmem_to_smem %s22_s20, 16, %s1080_s25, [#allocation4]  }
   0xd   :  { %p1065_p5 = scmp.ne.s32.totalorder %s32_s23, %s1064_s26  ;;  %p1069_p6 = scmp.lt.s32.totalorder %s32_s23, %s32_s23 }
   0xe   :  { %p1070_p7 = scmp.lt.s32.totalorder %s1064_s26, %s1064_s26 }
  0x10   :  { %p1071_p8 = por %p1070_p7, %p1069_p6 }
  0x12   :  { %p1072_p9 = pnand %p1071_p8, %p1065_p5 }
  0x14   :  { %1075 = shalt.err (!%p1072_p9)
}
  0x15   :  { %s1081_s1 = smov [#allocation5]  }
  0x16   :  { %34 = dma.vmem_to_smem %s32_s23, 16, %s1081_s1, [#allocation6]  }
  0x17   :  { %1076 = dma.done.wait [#allocation4], 16  }
  0x18   :  { %1077 = vsyncadd [#allocation4], 4294967280 }
  0x19   :  { %1078 = dma.done.wait [#allocation6], 16  }
  0x1a   :  { %1079 = vsyncadd [#allocation6], 4294967280 }
  0x1b   :  { %45 = sfence }
  0x1c   :  { %v1123_v0 = vld [vmem:[%s1616_s0] sm:$0xff]  ;;  %s1082_s28 = smov 127   ;;  %s1083_s29 = smov 1   ;;  %v1131_v1 = vld [vmem:[%s1616_s0 + $0x8] sm:$0xff]  ;;  %v1139_v2 = vld [vmem:[%s1616_s0 + $0x18] sm:$0xff]  ;;  %v46_v32 = vlaneseq  ;;  %vm703_vm2 = vcmask 64512  }
  0x1d   :  { %95 = vrot.lane.b32.xlu1 %v1123_v0, %s1082_s28  ;;  %83 = vrot.lane.b32.xlu0 %v1123_v0, %s1083_s29  ;;  %v1144_v3 = vld [vmem:[%s1616_s0 + $0x10] sm:$0xff]  ;;  %v743_v4 = vld [vmem:[%s1619_s3 + $0xf8] sm:$0xff]  ;;  %s715_s13 = sld [smem:[#allocation3 + $0x2]] }
  0x1e   :  { %v166_v5 = vld [vmem:[%s1619_s3 + $0x78] sm:$0xff]  ;;  %v742_v6 = vld [vmem:[%s1619_s3 + $0xf0] sm:$0xff]  ;;  %856 = vmatprep.subr.mxu0 %v743_v4  ;;  %v741_v8 = vld [vmem:[%s1619_s3 + $0xe8] sm:$0xff]  ;;  %s718_s14 = sld [smem:[#allocation3 + $0x5]]  ;;  %v47_v33 = vand.u32 127, %v46_v32 }
  0x1f   :  { %894 = vmatprep.subr.mxu1 %v166_v5  ;;  %v165_v7 = vld [vmem:[%s1619_s3 + $0x70] sm:$0xff]  ;;  %857 = vmatpush3.msra.mxu0 %v743_v4  ;;  %v164_v9 = vld [vmem:[%s1619_s3 + $0x68] sm:$0xff]  ;;  %v740_v10 = vld [vmem:[%s1619_s3 + $0xe0] sm:$0xff]  ;;  %s722_s0 = sld [smem:[#allocation3 + $0x8]] }
  0x20   :  { %895 = vmatpush3.msra.mxu1 %v166_v5  ;;  %858 = vmatprep.subr.mxu0 %v742_v6  ;;  %v163_v11 = vld [vmem:[%s1619_s3 + $0x60] sm:$0xff]  ;;  %v739_v12 = vld [vmem:[%s1619_s3 + $0xd8] sm:$0xff]  ;;  %v738_v14 = vld [vmem:[%s1619_s3 + $0xd0] sm:$0xff]  ;;  %s726_s15 = sld [smem:[#allocation3 + $0xb]]  ;;  %v52_v34 = vand.u32 15, %v47_v33 }
  0x21   :  { %97 = vrot.lane.b32.xlu1 %v1131_v1, %s1082_s28  ;;  %85 = vrot.lane.b32.xlu0 %v1131_v1, %s1083_s29  ;;  %v162_v13 = vld [vmem:[%s1619_s3 + $0x58] sm:$0xff]  ;;  %v161_v15 = vld [vmem:[%s1619_s3 + $0x50] sm:$0xff]  ;;  %s62_s16 = sld [smem:[#allocation3]] }
  0x22   :  { %896 = vmatprep.subr.mxu1 %v165_v7  ;;  %859 = vmatpush3.msra.mxu0 %v742_v6  ;;  %v737_v16 = vld [vmem:[%s1619_s3 + $0xc8] sm:$0xff]  ;;  %v736_v18 = vld [vmem:[%s1619_s3 + $0xc0] sm:$0xff]  ;;  %v735_v20 = vld [vmem:[%s1619_s3 + $0xb8] sm:$0xff]  ;;  %s714_s17 = sld [smem:[#allocation3 + $0x1]]  ;;  %vm1236_vm0 = vcmp.eq.s32.totalorder %v52_v34, 15  ;;  %vm1240_vm1 = vcmp.eq.s32.totalorder %v52_v34, 0 }
  0x23   :  { %897 = vmatpush3.msra.mxu1 %v165_v7  ;;  %860 = vmatprep.subr.mxu0 %v741_v8  ;;  %v160_v17 = vld [vmem:[%s1619_s3 + $0x48] sm:$0xff]  ;;  %v159_v19 = vld [vmem:[%s1619_s3 + $0x40] sm:$0xff]  ;;  %v158_v21 = vld [vmem:[%s1619_s3 + $0x38] sm:$0xff]  ;;  %s717_s18 = sld [smem:[#allocation3 + $0x4]]  ;;  %v1246_v39 = vstv %s715_s13 }
  0x24   :  { %898 = vmatprep.subr.mxu1 %v164_v9  ;;  %861 = vmatpush3.msra.mxu0 %v741_v8  ;;  %v734_v22 = vld [vmem:[%s1619_s3 + $0xb0] sm:$0xff]  ;;  %v733_v24 = vld [vmem:[%s1619_s3 + $0xa8] sm:$0xff]  ;;  %v732_v26 = vld [vmem:[%s1619_s3 + $0xa0] sm:$0xff]  ;;  %s716_s19 = sld [smem:[#allocation3 + $0x3]]  ;;  %v1248_v40 = vstv %s718_s14 }
  0x25   :  { %89 = vrot.lane.b32.xlu1 %v1139_v2, %s1083_s29  ;;  %87 = vrot.lane.b32.xlu0 %v1144_v3, %s1083_s29  ;;  %v157_v23 = vld [vmem:[%s1619_s3 + $0x30] sm:$0xff]  ;;  %v156_v25 = vld [vmem:[%s1619_s3 + $0x28] sm:$0xff]  ;;  %s721_s20 = sld [smem:[#allocation3 + $0x7]] }
  0x26   :  { %899 = vmatpush3.msra.mxu1 %v164_v9  ;;  %862 = vmatprep.subr.mxu0 %v740_v10  ;;  %v155_v27 = vld [vmem:[%s1619_s3 + $0x20] sm:$0xff]  ;;  %v731_v28 = vld [vmem:[%s1619_s3 + $0x98] sm:$0xff]  ;;  %v730_v30 = vld [vmem:[%s1619_s3 + $0x90] sm:$0xff]  ;;  %s720_s21 = sld [smem:[#allocation3 + $0x6]]  ;;  %v1250_v41 = vstv %s722_s0 }
  0x27   :  { %900 = vmatprep.subr.mxu1 %v163_v11  ;;  %863 = vmatpush3.msra.mxu0 %v740_v10  ;;  %v154_v29 = vld [vmem:[%s1619_s3 + $0x18] sm:$0xff]  ;;  %v153_v31 = vld [vmem:[%s1619_s3 + $0x10] sm:$0xff]  ;;  %s725_s22 = sld [smem:[#allocation3 + $0xa]]  ;;  %v1252_v42 = vstv %s726_s15  ;;  %v1256_v43 = vstv %s62_s16 }
  0x28   :  { %901 = vmatpush3.msra.mxu1 %v163_v11  ;;  %864 = vmatprep.subr.mxu0 %v739_v12  ;;  %s724_s23 = sld [smem:[#allocation3 + $0x9]]  ;;  %v112_v35 = vstv %s714_s17 }
  0x29   :  { %101 = vrot.lane.b32.xlu1 %v1139_v2, %s1082_s28  ;;  %99 = vrot.lane.b32.xlu0 %v1144_v3, %s1082_s28  ;;  %v172_v38 = vstv %s717_s18  ;;  %s1244_s24 = sld [smem:[#allocation5 + $0x1]]  ;;  %v113_v44 = vmul.f32 %v112_v35, %v1123_v0  ;;  %v114_v48 = vmul.f32 %v112_v35, %v1131_v1  ;;  %v1264_v49 = vmul.f32 %v112_v35, %v1139_v2 }
  0x2a   :  { %902 = vmatprep.subr.mxu1 %v162_v13  ;;  %865 = vmatpush3.msra.mxu0 %v739_v12  ;;  %s1254_s25 = sld [smem:[#allocation5]]  ;;  %v1259_v45 = vstv %s716_s19  ;;  %v173_v47 = vmul.f32 %v172_v38, %v1123_v0  ;;  %v1267_v50 = vmul.f32 %v112_v35, %v1144_v3  ;;  %v174_v53 = vmul.f32 %v172_v38, %v1131_v1 }
  0x2b   :  { %903 = vmatpush3.msra.mxu1 %v162_v13  ;;  %866 = vmatprep.subr.mxu0 %v738_v14  ;;  %v403_v46 = vstv %s721_s20  ;;  %v1271_v54 = vmul.f32 %v172_v38, %v1139_v2  ;;  %v175_v60 = vmul.f32 %v172_v38, %v1144_v3  ;;  %s1334_s26 = sld [smem:[#allocation5 + $0x2]] }
  0x2c   :  { %904 = vmatprep.subr.mxu1 %v161_v15  ;;  %867 = vmatpush3.msra.mxu0 %v738_v14  ;;  %v398_v51 = vstv %s720_s21  ;;  %v404_v57 = vmul.f32 %v403_v46, %v1123_v0  ;;  %v405_v59 = vmul.f32 %v403_v46, %v1131_v1  ;;  %v407_v63 = vmul.f32 %v403_v46, %v1139_v2  ;;  %s1354_s1 = sld [smem:[#allocation5 + $0x3]] }
  0x2d   :  { %905 = vmatpush3.msra.mxu1 %v161_v15  ;;  %868 = vmatprep.subr.mxu0 %v737_v16  ;;  %v553_v52 = vstv %s725_s22  ;;  %v406_v4 = vmul.f32 %v403_v46, %v1144_v3 }
  0x2e   :  { %906 = vmatprep.subr.mxu1 %v160_v17  ;;  %869 = vmatpush3.msra.mxu0 %v737_v16  ;;  %v548_v58 = vstv %s724_s23  ;;  %v554_v5 = vmul.f32 %v553_v52, %v1123_v0  ;;  %v555_v6 = vmul.f32 %v553_v52, %v1131_v1  ;;  %v557_v7 = vmul.f32 %v553_v52, %v1139_v2 }
  0x2f   :  { %907 = vmatpush3.msra.mxu1 %v160_v17  ;;  %870 = vmatprep.subr.mxu0 %v736_v18  ;;  %v556_v8 = vmul.f32 %v553_v52, %v1144_v3  ;;  %v1291_v17 = vstv %s1244_s24 }
  0x30   :  { %908 = vmatprep.subr.mxu1 %v159_v19  ;;  %871 = vmatpush3.msra.mxu0 %v736_v18  ;;  %v1294_v0 = vstv %s1254_s25 }
  0x31   :  { %909 = vmatpush3.msra.mxu1 %v159_v19  ;;  %872 = vmatprep.subr.mxu0 %v735_v20 }
  0x32   :  { %910 = vmatprep.subr.mxu1 %v158_v21  ;;  %873 = vmatpush3.msra.mxu0 %v735_v20 }
  0x33   :  { %911 = vmatpush3.msra.mxu1 %v158_v21  ;;  %874 = vmatprep.subr.mxu0 %v734_v22 }
  0x34   :  { %912 = vmatprep.subr.mxu1 %v157_v23  ;;  %875 = vmatpush3.msra.mxu0 %v734_v22 }
  0x35   :  { %913 = vmatpush3.msra.mxu1 %v157_v23  ;;  %876 = vmatprep.subr.mxu0 %v733_v24 }
  0x36   :  { %914 = vmatprep.subr.mxu1 %v156_v25  ;;  %877 = vmatpush3.msra.mxu0 %v733_v24 }
  0x37   :  { %915 = vmatpush3.msra.mxu1 %v156_v25  ;;  %878 = vmatprep.subr.mxu0 %v732_v26 }
  0x38   :  { %916 = vmatprep.subr.mxu1 %v155_v27  ;;  %879 = vmatpush3.msra.mxu0 %v732_v26 }
  0x39   :  { %917 = vmatpush3.msra.mxu1 %v155_v27  ;;  %880 = vmatprep.subr.mxu0 %v731_v28 }
  0x3a   :  { %918 = vmatprep.subr.mxu1 %v154_v29  ;;  %881 = vmatpush3.msra.mxu0 %v731_v28 }
  0x3b   :  { %919 = vmatpush3.msra.mxu1 %v154_v29  ;;  %882 = vmatprep.subr.mxu0 %v730_v30 }
  0x3c   :  { %920 = vmatprep.subr.mxu1 %v153_v31  ;;  %883 = vmatpush3.msra.mxu0 %v730_v30 }
  0x3d   :  { %921 = vmatpush3.msra.mxu1 %v153_v31 }
  0x8f   :  { %v96_v55 = vpop.permute.xlu1 %95  ;;  %v84_v56 = vpop.permute.xlu0 %83 }
  0x90   :  { %v103_v61 = vsel %vm1236_vm0, 0.0, %v96_v55  ;;  %v91_v62 = vsel %vm1240_vm1, 0.0, %v84_v56 }
  0x91   :  { %v108_v9 = vmul.f32 %v1256_v43, %v91_v62  ;;  %v168_v10 = vmul.f32 %v1259_v45, %v91_v62  ;;  %v399_v11 = vmul.f32 %v398_v51, %v91_v62  ;;  %v549_v12 = vmul.f32 %v548_v58, %v91_v62 }
  0x92   :  { %v122_v13 = vmul.f32 %v1246_v39, %v103_v61  ;;  %v182_v14 = vmul.f32 %v1248_v40, %v103_v61  ;;  %v1297_v1 = vmul.f32 %v1250_v41, %v103_v61  ;;  %v1300_v2 = vmul.f32 %v1252_v42, %v103_v61 }
  0x93   :  { %v98_v15 = vpop.permute.xlu1 %97  ;;  %v86_v16 = vpop.permute.xlu0 %85  ;;  %v117_v3 = vadd.f32 %v113_v44, %v108_v9  ;;  %v177_v18 = vadd.f32 %v173_v47, %v168_v10  ;;  %v1302_v19 = vadd.f32 %v404_v57, %v399_v11  ;;  %v1304_v20 = vadd.f32 %v554_v5, %v549_v12 }
  0x94   :  { %v104_v21 = vsel %vm1236_vm0, 0.0, %v98_v15  ;;  %v92_v22 = vsel %vm1240_vm1, 0.0, %v86_v16  ;;  %v152_v16 = vld [vmem:[%s1619_s3 + $0x8] sm:$0xff] }
  0x95   :  { %v1311_v23 = vmul.f32 %v1246_v39, %v104_v21  ;;  %v183_v24 = vmul.f32 %v1248_v40, %v104_v21  ;;  %v1315_v25 = vmul.f32 %v1250_v41, %v104_v21  ;;  %v1318_v26 = vmul.f32 %v1252_v42, %v104_v21  ;;  %922 = vmatprep.subr.mxu1 %v152_v16 }
  0x96   :  { %v109_v27 = vmul.f32 %v1256_v43, %v92_v22  ;;  %v169_v28 = vmul.f32 %v1259_v45, %v92_v22  ;;  %v400_v29 = vmul.f32 %v398_v51, %v92_v22  ;;  %v550_v30 = vmul.f32 %v548_v58, %v92_v22  ;;  %923 = vmatpush3.msra.mxu1 %v152_v16 }
  0x97   :  { %v90_v31 = vpop.permute.xlu1 %89  ;;  %v88_v32 = vpop.permute.xlu0 %87  ;;  %v186_v35 = vadd.f32 %v182_v14, %v177_v18  ;;  %v126_v38 = vadd.f32 %v122_v13, %v117_v3 }
  0x98   :  { %v94_v33 = vsel %vm1240_vm1, 0.0, %v90_v31  ;;  %v93_v34 = vsel %vm1240_vm1, 0.0, %v88_v32  ;;  %v118_v44 = vadd.f32 %v114_v48, %v109_v27  ;;  %v178_v46 = vadd.f32 %v174_v53, %v169_v28  ;;  %v151_v27 = vld [vmem:[%s1619_s3] sm:$0xff]  ;;  %v1379_v32 = vld [vmem:[%s1619_s3 + $0x178] sm:$0xff] }
  0x99   :  { %v1326_v47 = vadd.f32 %v405_v59, %v400_v29  ;;  %v1328_v52 = vadd.f32 %v555_v6, %v550_v30  ;;  %v111_v55 = vmul.f32 %v1256_v43, %v94_v33  ;;  %v171_v56 = vmul.f32 %v1259_v45, %v94_v33  ;;  %924 = vmatprep.subr.mxu1 %v151_v27 }
  0x9a   :  { %v402_v57 = vmul.f32 %v398_v51, %v94_v33  ;;  %v552_v61 = vmul.f32 %v548_v58, %v94_v33  ;;  %v110_v62 = vmul.f32 %v1256_v43, %v93_v34  ;;  %v170_v5 = vmul.f32 %v1259_v45, %v93_v34  ;;  %925 = vmatpush3.msra.mxu1 %v151_v27 }
  0x9b   :  { %v401_v37 = vmul.f32 %v398_v51, %v93_v34  ;;  %v551_v9 = vmul.f32 %v548_v58, %v93_v34  ;;  %v102_v10 = vpop.permute.xlu1 %101  ;;  %v100_v11 = vpop.permute.xlu0 %99  ;;  %v120_v48 = vadd.f32 %v1264_v49, %v111_v55  ;;  %v180_v53 = vadd.f32 %v1271_v54, %v171_v56 }
  0x9c   :  { %v411_v59 = vadd.f32 %v407_v63, %v402_v57  ;;  %v561_v6 = vadd.f32 %v557_v7, %v552_v61  ;;  %v119_v12 = vadd.f32 %v1267_v50, %v110_v62  ;;  %v179_v13 = vadd.f32 %v175_v60, %v170_v5 }
  0x9d   :  { %v410_v14 = vadd.f32 %v406_v4, %v401_v37  ;;  %v560_v15 = vadd.f32 %v556_v8, %v551_v9  ;;  %v106_v43 = vsel %vm1236_vm0, 0.0, %v102_v10  ;;  %v105_v45 = vsel %vm1236_vm0, 0.0, %v100_v11  ;;  %v729_v8 = vld [vmem:[%s1619_s3 + $0x88] sm:$0xff] }
  0x9e   :  { %v187_v51 = vadd.f32 %v183_v24, %v178_v46  ;;  %v1344_v58 = vadd.f32 %v1291_v17, %v186_v35  ;;  %v125_v49 = vmul.f32 %v1246_v39, %v106_v43  ;;  %v185_v54 = vmul.f32 %v1248_v40, %v106_v43  ;;  %884 = vmatprep.subr.mxu0 %v729_v8 }
  0x9f   :  { %v416_v63 = vmul.f32 %v1250_v41, %v106_v43  ;;  %v566_v50 = vmul.f32 %v1252_v42, %v106_v43  ;;  %v124_v60 = vmul.f32 %v1246_v39, %v105_v45  ;;  %v184_v4 = vmul.f32 %v1248_v40, %v105_v45  ;;  %v728_v40 = vld [vmem:[%s1619_s3 + $0x80] sm:$0xff]  ;;  %885 = vmatpush3.msra.mxu0 %v729_v8 }
  0xa0   :  { %v415_v7 = vmul.f32 %v1250_v41, %v105_v45  ;;  %v565_v36 = vmul.f32 %v1252_v42, %v105_v45  ;;  %v129_v3 = vadd.f32 %v125_v49, %v120_v48  ;;  %v189_v18 = vadd.f32 %v185_v54, %v180_v53  ;;  %886 = vmatprep.subr.mxu0 %v728_v40 }
  0xa1   :  { %v420_v39 = vadd.f32 %v416_v63, %v411_v59  ;;  %v570_v21 = vadd.f32 %v566_v50, %v561_v6  ;;  %v128_v41 = vadd.f32 %v124_v60, %v119_v12  ;;  %v188_v42 = vadd.f32 %v184_v4, %v179_v13  ;;  %887 = vmatpush3.msra.mxu0 %v728_v40 }
  0xa2   :  { %v419_v22 = vadd.f32 %v415_v7, %v410_v14  ;;  %v569_v24 = vadd.f32 %v565_v36, %v560_v15  ;;  %v1369_v28 = vadd.f32 %v1291_v17, %v187_v51  ;;  %v127_v29 = vadd.f32 %v1311_v23, %v118_v44  ;;  %932 = vmatprep.subr.mxu0 %v1379_v32 }
  0xa3   :  { %v1373_v30 = vadd.f32 %v1294_v0, %v126_v38  ;;  %v421_v31 = vstv %s1334_s26  ;;  %v1382_v33 = vadd.f32 %v1291_v17, %v188_v42  ;;  %v1385_v34 = vadd.f32 %v1291_v17, %v189_v18  ;;  %v1396_v38 = vld [vmem:[%s1619_s3 + $0x1f8] sm:$0xff]  ;;  %v758_v42 = vld [vmem:[%s1619_s3 + $0x170] sm:$0xff] }
  0xa4   :  { %v1388_v35 = vadd.f32 %v1294_v0, %v128_v41  ;;  %v1391_v23 = vadd.f32 %v1294_v0, %v129_v3  ;;  %v195_v44 = vmax.f32 %v1344_v58, 0.0  ;;  %v196_v46 = vmax.f32 %v1369_v28, 0.0  ;;  %970 = vmatprep.subr.mxu1 %v1396_v38 }
  0xa5   :  { %v132_v55 = vadd.f32 %v1294_v0, %v127_v29  ;;  %v417_v17 = vadd.f32 %v1297_v1, %v1302_v19  ;;  %v197_v56 = vmax.f32 %v1382_v33, 0.0  ;;  %v198_v57 = vmax.f32 %v1385_v34, 0.0  ;;  %v774_v29 = vld [vmem:[%s1619_s3 + $0x1f0] sm:$0xff]  ;;  %v755_v34 = vld [vmem:[%s1619_s3 + $0x158] sm:$0xff] }
  0xa6   :  { %v137_v61 = vmax.f32 %v1388_v35, 0.0  ;;  %v138_v62 = vmax.f32 %v1391_v23, 0.0  ;;  %v1012_v5 = vpack.i.bf16 %v196_v46, %v195_v44  ;;  %v135_v0 = vmax.f32 %v1373_v30, 0.0  ;;  %v757_v30 = vld [vmem:[%s1619_s3 + $0x168] sm:$0xff]  ;;  %v771_v23 = vld [vmem:[%s1619_s3 + $0x1d8] sm:$0xff] }
  0xa7   :  { %v136_v37 = vmax.f32 %v132_v55, 0.0  ;;  %v418_v1 = vadd.f32 %v1315_v25, %v1326_v47  ;;  %v1412_v19 = vadd.f32 %v421_v31, %v417_v17  ;;  %v567_v9 = vadd.f32 %v1300_v2, %v1304_v20 }
  0xa8   :  { %v568_v10 = vadd.f32 %v1318_v26, %v1328_v52  ;;  %v571_v11 = vstv %s1354_s1  ;;  %1013 = vrot.lane.b32.xlu0 %v1012_v5, %s1082_s28  ;;  %v1022_v53 = vpack.i.bf16 %v198_v57, %v197_v56  ;;  %v1426_v47 = vadd.f32 %v421_v31, %v419_v22  ;;  %v754_v5 = vld [vmem:[%s1619_s3 + $0x150] sm:$0xff] }
  0xa9   :  { %v1017_v48 = vpack.i.bf16 %v136_v37, %v135_v0  ;;  %v1424_v25 = vadd.f32 %v421_v31, %v418_v1  ;;  %v1027_v2 = vpack.i.bf16 %v138_v62, %v137_v61  ;;  %v1434_v26 = vadd.f32 %v421_v31, %v420_v39  ;;  %v769_v1 = vld [vmem:[%s1619_s3 + $0x1c8] sm:$0xff] }
  0xaa   :  { %v1432_v20 = vadd.f32 %v571_v11, %v568_v10  ;;  %v1438_v59 = vadd.f32 %v571_v11, %v567_v9  ;;  %v1440_v6 = vadd.f32 %v571_v11, %v569_v24  ;;  %v1442_v12 = vadd.f32 %v571_v11, %v570_v21  ;;  %v768_v9 = vld [vmem:[%s1619_s3 + $0x1c0] sm:$0xff]  ;;  %v751_v10 = vld [vmem:[%s1619_s3 + $0x138] sm:$0xff] }
  0xab   :  { %1018 = vrot.lane.b32.xlu1 %v1017_v48, %s1082_s28  ;;  %v427_v52 = vmax.f32 %v1424_v25, 0.0  ;;  %v426_v13 = vmax.f32 %v1412_v19, 0.0  ;;  %v428_v15 = vmax.f32 %v1426_v47, 0.0  ;;  %v429_v43 = vmax.f32 %v1434_v26, 0.0  ;;  %v752_v19 = vld [vmem:[%s1619_s3 + $0x140] sm:$0xff]  ;;  %v767_v11 = vld [vmem:[%s1619_s3 + $0x1b8] sm:$0xff] }
  0xac   :  { %1023 = vrot.lane.b32.xlu0 %v1022_v53, %s1082_s28  ;;  %v577_v14 = vmax.f32 %v1432_v20, 0.0  ;;  %v576_v51 = vmax.f32 %v1438_v59, 0.0  ;;  %v578_v58 = vmax.f32 %v1440_v6, 0.0  ;;  %v579_v49 = vmax.f32 %v1442_v12, 0.0  ;;  %v750_v48 = vld [vmem:[%s1619_s3 + $0x130] sm:$0xff]  ;;  %v765_v59 = vld [vmem:[%s1619_s3 + $0x1a8] sm:$0xff] }
  0xad   :  { %v1032_v45 = vpack.i.bf16 %v427_v52, %v426_v13  ;;  %v1042_v63 = vpack.i.bf16 %v429_v43, %v428_v15  ;;  %v766_v53 = vld [vmem:[%s1619_s3 + $0x1b0] sm:$0xff]  ;;  %v698_v26 = vstv %s1620_s4 }
  0xae   :  { %v1037_v54 = vpack.i.bf16 %v577_v14, %v576_v51  ;;  %v1047_v50 = vpack.i.bf16 %v579_v49, %v578_v58 }
  0xaf   :  { %1028 = vrot.lane.b32.xlu1 %v1027_v2, %s1082_s28  ;;  %v749_v2 = vld [vmem:[%s1619_s3 + $0x128] sm:$0xff] }
  0xb0   :  { %1033 = vrot.lane.b32.xlu0 %v1032_v45, %s1082_s28  ;;  %v764_v45 = vld [vmem:[%s1619_s3 + $0x1a0] sm:$0xff] }
  0xb3   :  { %1038 = vrot.lane.b32.xlu1 %v1037_v54, %s1082_s28  ;;  %v763_v54 = vld [vmem:[%s1619_s3 + $0x198] sm:$0xff] }
  0xb4   :  { %1043 = vrot.lane.b32.xlu0 %v1042_v63, %s1082_s28  ;;  %v746_v63 = vld [vmem:[%s1619_s3 + $0x110] sm:$0xff] }
  0xb7   :  { %1048 = vrot.lane.b32.xlu1 %v1047_v50, %s1082_s28  ;;  %v762_v50 = vld [vmem:[%s1619_s3 + $0x190] sm:$0xff] }
 0x11a   :  { %v1014_v60 = vpop.permute.xlu0 %1013 }
 0x11b   :  { %v1016_v4 = vunpack.i.h.bf16 %v1014_v60  ;;  %v1015_v7 = vunpack.i.l.bf16 %v1014_v60 }
 0x11d   :  { %v1019_v36 = vpop.permute.xlu1 %1018  ;;  %v208_v8 = vmax.f32 %v196_v46, %v1016_v4  ;;  %v207_v18 = vmax.f32 %v195_v44, %v1015_v7  ;;  %v773_v46 = vld [vmem:[%s1619_s3 + $0x1e8] sm:$0xff] }
 0x11e   :  { %v1021_v16 = vunpack.i.h.bf16 %v1019_v36  ;;  %v1020_v3 = vunpack.i.l.bf16 %v1019_v36  ;;  %v1024_v39 = vpop.permute.xlu0 %1023  ;;  %v745_v7 = vld [vmem:[%s1619_s3 + $0x108] sm:$0xff] }
 0x11f   :  { %888 = vmatprep.mubr.f32.mxu0 %v207_v18  ;;  %v1025_v41 = vunpack.i.l.bf16 %v1024_v39  ;;  %v1026_v24 = vunpack.i.h.bf16 %v1024_v39  ;;  %v761_v36 = vld [vmem:[%s1619_s3 + $0x188] sm:$0xff]  ;;  %v744_v39 = vld [vmem:[%s1619_s3 + $0x100] sm:$0xff] }
 0x120   :  { %v148_v21 = vmax.f32 %v136_v37, %v1021_v16  ;;  %v147_v40 = vmax.f32 %v135_v0, %v1020_v3  ;;  %889 = vmatmul.mubr.f32.vlgmr.msra.gmra.mxu0 %v208_v8  ;;  %v770_v0 = vld [vmem:[%s1619_s3 + $0x1d0] sm:$0xff]  ;;  %v753_v37 = vld [vmem:[%s1619_s3 + $0x148] sm:$0xff] }
 0x121   :  { %v1029_v22 = vpop.permute.xlu1 %1028  ;;  %933 = vmatpush3.msra.mxu0 %v1379_v32  ;;  %v209_v31 = vmax.f32 %v197_v56, %v1025_v41  ;;  %v210_v33 = vmax.f32 %v198_v57, %v1026_v24  ;;  %v772_v56 = vld [vmem:[%s1619_s3 + $0x1e0] sm:$0xff] }
 0x122   :  { %926 = vmatprep.mubr.f32.mxu1 %v147_v40  ;;  %v1031_v27 = vunpack.i.h.bf16 %v1029_v22  ;;  %v1030_v28 = vunpack.i.l.bf16 %v1029_v22  ;;  %934 = vmatprep.subr.mxu0 %v758_v42  ;;  %v1485_v44 = vpop.permute.xlu0 %1033 }
 0x123   :  { %927 = vmatmul.mubr.f32.vlgmr.msra.gmra.mxu1 %v148_v21  ;;  %935 = vmatpush3.msra.mxu0 %v758_v42  ;;  %v1035_v35 = vunpack.i.l.bf16 %v1485_v44  ;;  %v1036_v8 = vunpack.i.h.bf16 %v1485_v44  ;;  %v760_v21 = vld [vmem:[%s1619_s3 + $0x180] sm:$0xff] }
 0x124   :  { %v149_v32 = vmax.f32 %v137_v61, %v1030_v28  ;;  %971 = vmatpush3.msra.mxu1 %v1396_v38  ;;  %936 = vmatprep.subr.mxu0 %v757_v30  ;;  %v150_v17 = vmax.f32 %v138_v62, %v1031_v27  ;;  %v756_v38 = vld [vmem:[%s1619_s3 + $0x160] sm:$0xff] }
 0x125   :  { %972 = vmatprep.subr.mxu1 %v774_v29  ;;  %v1493_v55 = vpop.permute.xlu1 %1038  ;;  %937 = vmatpush3.msra.mxu0 %v757_v30  ;;  %v438_v57 = vmax.f32 %v426_v13, %v1035_v35  ;;  %v748_v13 = vld [vmem:[%s1619_s3 + $0x120] sm:$0xff]  ;;  %v439_v40 = vmax.f32 %v427_v52, %v1036_v8 }
 0x126   :  { %973 = vmatpush3.msra.mxu1 %v774_v29  ;;  %v1040_v61 = vunpack.i.l.bf16 %v1493_v55  ;;  %891 = vmatprep.mubr.f32.mxu0 %v209_v31  ;;  %v1044_v60 = vpop.permute.xlu0 %1043  ;;  %v1041_v16 = vunpack.i.h.bf16 %v1493_v55 }
 0x127   :  { %974 = vmatprep.subr.mxu1 %v773_v46  ;;  %929 = vmatprep.mubr.f32.mxu1 %v149_v32  ;;  %v1045_v3 = vunpack.i.l.bf16 %v1044_v60  ;;  %v1046_v42 = vunpack.i.h.bf16 %v1044_v60 }
 0x128   :  { %975 = vmatpush3.msra.mxu1 %v773_v46  ;;  %938 = vmatprep.subr.mxu0 %v756_v38  ;;  %v588_v62 = vmax.f32 %v576_v51, %v1040_v61  ;;  %v747_v51 = vld [vmem:[%s1619_s3 + $0x118] sm:$0xff]  ;;  %v589_v41 = vmax.f32 %v577_v14, %v1041_v16 }
 0x129   :  { %976 = vmatprep.subr.mxu1 %v772_v56  ;;  %892 = vmatmul.mubr.f32.gmra.mxu0 %v210_v33  ;;  %v1049_v4 = vpop.permute.xlu1 %1048  ;;  %v440_v24 = vmax.f32 %v428_v15, %v1045_v3  ;;  %v441_v25 = vmax.f32 %v429_v43, %v1046_v42 }
 0x12a   :  { %930 = vmatmul.mubr.f32.gmra.mxu1 %v150_v17  ;;  %939 = vmatpush3.msra.mxu0 %v756_v38  ;;  %v1050_v18 = vunpack.i.l.bf16 %v1049_v4  ;;  %v1051_v22 = vunpack.i.h.bf16 %v1049_v4 }
 0x12b   :  { %977 = vmatpush3.msra.mxu1 %v772_v56  ;;  %940 = vmatprep.subr.mxu0 %v755_v34 }
 0x12c   :  { %978 = vmatprep.subr.mxu1 %v771_v23  ;;  %941 = vmatpush3.msra.mxu0 %v755_v34  ;;  %v590_v27 = vmax.f32 %v578_v58, %v1050_v18  ;;  %v591_v20 = vmax.f32 %v579_v49, %v1051_v22 }
 0x12d   :  { %979 = vmatpush3.msra.mxu1 %v771_v23  ;;  %942 = vmatprep.subr.mxu0 %v754_v5 }
 0x12e   :  { %964 = vmatprep.mubr.f32.mxu0 %v438_v57  ;;  %980 = vmatprep.subr.mxu1 %v770_v0 }
 0x12f   :  { %1002 = vmatprep.mubr.f32.mxu1 %v588_v62  ;;  %943 = vmatpush3.msra.mxu0 %v754_v5 }
 0x130   :  { %981 = vmatpush3.msra.mxu1 %v770_v0  ;;  %944 = vmatprep.subr.mxu0 %v753_v37 }
 0x131   :  { %982 = vmatprep.subr.mxu1 %v769_v1  ;;  %945 = vmatpush3.msra.mxu0 %v753_v37 }
 0x132   :  { %983 = vmatpush3.msra.mxu1 %v769_v1  ;;  %946 = vmatprep.subr.mxu0 %v752_v19 }
 0x133   :  { %984 = vmatprep.subr.mxu1 %v768_v9  ;;  %947 = vmatpush3.msra.mxu0 %v752_v19 }
 0x134   :  { %985 = vmatpush3.msra.mxu1 %v768_v9  ;;  %948 = vmatprep.subr.mxu0 %v751_v10 }
 0x135   :  { %986 = vmatprep.subr.mxu1 %v767_v11  ;;  %949 = vmatpush3.msra.mxu0 %v751_v10 }
 0x136   :  { %987 = vmatpush3.msra.mxu1 %v767_v11  ;;  %950 = vmatprep.subr.mxu0 %v750_v48 }
 0x137   :  { %988 = vmatprep.subr.mxu1 %v766_v53  ;;  %951 = vmatpush3.msra.mxu0 %v750_v48 }
 0x138   :  { %989 = vmatpush3.msra.mxu1 %v766_v53  ;;  %952 = vmatprep.subr.mxu0 %v749_v2 }
 0x139   :  { %990 = vmatprep.subr.mxu1 %v765_v59  ;;  %953 = vmatpush3.msra.mxu0 %v749_v2 }
 0x13a   :  { %991 = vmatpush3.msra.mxu1 %v765_v59  ;;  %954 = vmatprep.subr.mxu0 %v748_v13 }
 0x13b   :  { %992 = vmatprep.subr.mxu1 %v764_v45  ;;  %955 = vmatpush3.msra.mxu0 %v748_v13 }
 0x13c   :  { %993 = vmatpush3.msra.mxu1 %v764_v45  ;;  %956 = vmatprep.subr.mxu0 %v747_v51 }
 0x13d   :  { %994 = vmatprep.subr.mxu1 %v763_v54  ;;  %957 = vmatpush3.msra.mxu0 %v747_v51 }
 0x13e   :  { %995 = vmatpush3.msra.mxu1 %v763_v54  ;;  %958 = vmatprep.subr.mxu0 %v746_v63 }
 0x13f   :  { %996 = vmatprep.subr.mxu1 %v762_v50  ;;  %959 = vmatpush3.msra.mxu0 %v746_v63 }
 0x140   :  { %997 = vmatpush3.msra.mxu1 %v762_v50  ;;  %960 = vmatprep.subr.mxu0 %v745_v7 }
 0x141   :  { %998 = vmatprep.subr.mxu1 %v761_v36  ;;  %961 = vmatpush3.msra.mxu0 %v745_v7 }
 0x142   :  { %999 = vmatpush3.msra.mxu1 %v761_v36  ;;  %962 = vmatprep.subr.mxu0 %v744_v39 }
 0x143   :  { %1000 = vmatprep.subr.mxu1 %v760_v21  ;;  %963 = vmatpush3.msra.mxu0 %v744_v39 }
 0x144   :  { %1001 = vmatpush3.msra.mxu1 %v760_v21  ;;  %965 = vmatmul.mubr.f32.vlgmr.msra.gmra.mxu0 %v439_v40 }
 0x145   :  { %1003 = vmatmul.mubr.f32.vlgmr.msra.gmra.mxu1 %v589_v41  ;;  %967 = vmatprep.mubr.f32.mxu0 %v440_v24 }
 0x146   :  { %1005 = vmatprep.mubr.f32.mxu1 %v590_v27 }
 0x148   :  { %968 = vmatmul.mubr.f32.gmra.mxu0 %v441_v25 }
 0x149   :  { %1006 = vmatmul.mubr.f32.gmra.mxu1 %v591_v20 }
 0x1e0   :  { %v890_v52 = vpop.f32.mrf.mxu0 }
 0x1e2   :  { %v294_v14 = vpop.f32.mrf.mxu0 }
 0x1e3   :  { %v928_v47 = vpop.f32.mrf.mxu1 }
 0x1e4   :  { %v385_v30 = vadd.f32 %v928_v47, %v890_v52 }
 0x1e5   :  { %v379_v15 = vpop.f32.mrf.mxu1 }
 0x1e6   :  { %v380_v32 = vadd.f32 %v379_v15, %v294_v14 }
 0x1e9   :  { %v893_v6 = vpop.f32.mrf.mxu0 }
 0x1ea   :  { %v931_v58 = vpop.f32.mrf.mxu1 }
 0x1eb   :  { %v304_v28 = vpop.f32.mrf.mxu0  ;;  %v395_v49 = vadd.f32 %v931_v58, %v893_v6 }
 0x1ec   :  { %v389_v29 = vpop.f32.mrf.mxu1 }
 0x1ed   :  { %v390_v38 = vadd.f32 %v389_v29, %v304_v28 }
 0x204   :  { %v966_v31 = vpop.f32.mrf.mxu0 }
 0x205   :  { %v1004_v44 = vpop.f32.mrf.mxu1  ;;  %v545_v46 = vadd.f32 %v966_v31, %v385_v30 }
 0x206   :  { %v525_v12 = vpop.f32.mrf.mxu0 }
 0x207   :  { %v675_v43 = vpop.f32.mrf.mxu1  ;;  %v695_v55 = vadd.f32 %v1004_v44, %v545_v46  ;;  %v544_v33 = vadd.f32 %v525_v12, %v380_v32 }
 0x208   :  { %v969_v17 = vpop.f32.mrf.mxu0 }
 0x209   :  { %v1007_v35 = vpop.f32.mrf.mxu1  ;;  %v700_v56 = vadd.f32 %v698_v26, %v695_v55  ;;  %v694_v61 = vadd.f32 %v675_v43, %v544_v33  ;;  %v547_v34 = vadd.f32 %v969_v17, %v395_v49 }
 0x20a   :  { %v535_v23 = vpop.f32.mrf.mxu0 }
 0x20b   :  { %705 = vst.msk [vmem:[%s1621_s5 + $0x8] sm:$0xff] %vm703_vm2, %v700_v56  ;;  %v699_v57 = vadd.f32 %v698_v26, %v694_v61  ;;  %v697_v62 = vadd.f32 %v1007_v35, %v547_v34  ;;  %v546_v5 = vadd.f32 %v535_v23, %v390_v38  ;;  %v685_v0 = vpop.f32.mrf.mxu1 }
 0x20d   :  { %704 = vst.msk [vmem:[%s1621_s5] sm:$0xff] %vm703_vm2, %v699_v57  ;;  %v702_v37 = vadd.f32 %v698_v26, %v697_v62  ;;  %v696_v1 = vadd.f32 %v685_v0, %v546_v5 }
 0x20f   :  { %707 = vst.msk [vmem:[%s1621_s5 + $0x18] sm:$0xff] %vm703_vm2, %v702_v37  ;;  %v701_v19 = vadd.f32 %v698_v26, %v696_v1 }
 0x211   :  { %706 = vst.msk [vmem:[%s1621_s5 + $0x10] sm:$0xff] %vm703_vm2, %v701_v19 }
 0x212   :  { %712 = vsyncpa [#allocation4], 1 }
 0x213   :  { %713 = vsyncpa [#allocation6], 1 }

</bundles_post_ra>
